<compile_context>
chip_gen: v7x
topology: tpu7x:2x2x1
jax: 0.10.0
libtpu: 0.0.40
codegen_flags: <defaults>
</compile_context>

<pallas_src>
import functools

import jax
import jax.numpy as jnp
from jax import lax
from jax.experimental import pallas as pl
from jax.experimental.pallas import tpu as pltpu


def _box_loss_kernel(nvalid_ref, invn_ref, boxes_ref, out_ref,
                     acc_bbox, acc_giou, *, tile_rows, chunks_per_core):
    i = pl.program_id(0)            # core-split index ("parallel")
    j = pl.program_id(1)            # chunk index within this core ("arbitrary")
    nj = pl.num_programs(1)
    tile_n = tile_rows * 128

    @pl.when(j == 0)
    def _init():
        acc_bbox[...] = jnp.zeros_like(acc_bbox)
        acc_giou[...] = jnp.zeros_like(acc_giou)

    # Dense (tile_rows, 128) coordinate planes.
    pcx, pcy, pw, ph = boxes_ref[0], boxes_ref[1], boxes_ref[2], boxes_ref[3]
    tcx, tcy, tw, th = boxes_ref[4], boxes_ref[5], boxes_ref[6], boxes_ref[7]

    # Validity mask for padded boxes (global box index < num_boxes).
    base = (i * chunks_per_core + j) * tile_n
    row = lax.broadcasted_iota(jnp.int32, (tile_rows, 128), 0)
    lane = lax.broadcasted_iota(jnp.int32, (tile_rows, 128), 1)
    valid = (base + row * 128 + lane) < nvalid_ref[0]

    # ---- L1 bbox loss (per-box sum over the 4 coords) ----
    l1 = (jnp.abs(pcx - tcx) + jnp.abs(pcy - tcy)
          + jnp.abs(pw - tw) + jnp.abs(ph - th))

    # ---- GIoU (center format -> corners, row-wise GIoU) ----
    px1 = pcx - 0.5 * pw
    py1 = pcy - 0.5 * ph
    px2 = pcx + 0.5 * pw
    py2 = pcy + 0.5 * ph
    tx1 = tcx - 0.5 * tw
    ty1 = tcy - 0.5 * th
    tx2 = tcx + 0.5 * tw
    ty2 = tcy + 0.5 * th

    area_p = (px2 - px1) * (py2 - py1)
    area_t = (tx2 - tx1) * (ty2 - ty1)

    iw = jnp.maximum(jnp.minimum(px2, tx2) - jnp.maximum(px1, tx1), 0.0)
    ih = jnp.maximum(jnp.minimum(py2, ty2) - jnp.maximum(py1, ty1), 0.0)
    inter = iw * ih
    union = area_p + area_t - inter
    iou = inter * pl.reciprocal(union, approx=False)

    ew = jnp.maximum(jnp.maximum(px2, tx2) - jnp.minimum(px1, tx1), 0.0)
    eh = jnp.maximum(jnp.maximum(py2, ty2) - jnp.minimum(py1, ty1), 0.0)
    enclose = ew * eh
    giou = iou - (enclose - union) * pl.reciprocal(enclose, approx=False)

    # VPU-only per-tile accumulation (masked).
    acc_bbox[...] += jnp.where(valid, l1, 0.0)
    acc_giou[...] += jnp.where(valid, 1.0 - giou, 0.0)

    # Cross-lane reduce + divide + store once per core, at the last chunk.
    @pl.when(j == nj - 1)
    def _finalize():
        inv_n = invn_ref[0]
        bbox_s = jnp.sum(acc_bbox[...], keepdims=True) * inv_n   # (1, 1)
        giou_s = jnp.sum(acc_giou[...], keepdims=True) * inv_n   # (1, 1)
        orow = lax.broadcasted_iota(jnp.int32, (8, 128), 0)
        olane = lax.broadcasted_iota(jnp.int32, (8, 128), 1)
        out = jnp.where((orow == 0) & (olane == 0), bbox_s, 0.0)
        out = jnp.where((orow == 0) & (olane == 1), giou_s, out)
        out_ref[...] = out


def box_decoder_loss(pred_boxes, target_boxes, target_slices=None, *,
                     tile_rows=64, core_splits=2):
    """pred_boxes, target_boxes: [N, 4] in (cx, cy, w, h), normalized."""
    del target_slices  # unused when matcher is None (reference semantics)
    n = int(pred_boxes.shape[0])
    assert target_boxes.shape == pred_boxes.shape

    tile_n = tile_rows * 128
    step = core_splits * tile_n
    n_pad = max(((n + step - 1) // step) * step, step)
    chunks_per_core = n_pad // step

    pred = pred_boxes.astype(jnp.float32)
    tgt = target_boxes.astype(jnp.float32)
    # Pad with non-degenerate dummy boxes (masked out in-kernel; keeps GIoU finite).
    filler = jnp.broadcast_to(jnp.array([0.5, 0.5, 1.0, 1.0], jnp.float32),
                              (n_pad - n, 4))
    # Single fused pack: pred coords -> planes 0..3, target coords -> planes 4..7.
    packed = jnp.concatenate(
        [jnp.concatenate([pred, filler], axis=0).T,
         jnp.concatenate([tgt, filler], axis=0).T],
        axis=0,
    ).reshape(8, n_pad // 128, 128)

    n_valid = jnp.array([n], dtype=jnp.int32)          # runtime SMEM scalars:
    inv_n = jnp.array([1.0 / n], dtype=jnp.float32)    # no recompile per N

    kernel = functools.partial(_box_loss_kernel, tile_rows=tile_rows,
                               chunks_per_core=chunks_per_core)

    out = pl.pallas_call(
        kernel,
        out_shape=jax.ShapeDtypeStruct((core_splits * 8, 128), jnp.float32),
        grid=(core_splits, chunks_per_core),
        in_specs=[
            pl.BlockSpec(memory_space=pltpu.MemorySpace.SMEM),   # n_valid
            pl.BlockSpec(memory_space=pltpu.MemorySpace.SMEM),   # 1 / num_boxes
            pl.BlockSpec((8, tile_rows, 128),
                         lambda i, j: (0, i * chunks_per_core + j, 0)),
        ],
        out_specs=pl.BlockSpec((8, 128), lambda i, j: (i, 0)),
        scratch_shapes=[
            pltpu.VMEM((tile_rows, 128), jnp.float32),   # bbox partial sums
            pltpu.VMEM((tile_rows, 128), jnp.float32),   # giou partial sums
        ],
        compiler_params=pltpu.CompilerParams(
            dimension_semantics=("parallel", "arbitrary"),
            vmem_limit_bytes=32 * 1024 * 1024,
        ),
        cost_estimate=pl.CostEstimate(
            flops=40 * n_pad,
            transcendentals=2 * n_pad,
            bytes_accessed=int(packed.size) * 4 + core_splits * 8 * 128 * 4 + 8,
        ),
    )(n_valid, inv_n, packed)

    per_core = out.reshape(core_splits, 8, 128)
    loss_bbox = jnp.sum(per_core[:, 0, 0])
    loss_giou = jnp.sum(per_core[:, 0, 1])
    return {"loss_bbox": loss_bbox, "loss_giou": loss_giou}


# ---------------- pure-JAX reference (for correctness check only) -------------
def _ref_c2c(b):
    cx, cy, w, h = b[:, 0], b[:, 1], b[:, 2], b[:, 3]
    return jnp.stack([cx - 0.5 * w, cy - 0.5 * h, cx + 0.5 * w, cy + 0.5 * h], axis=-1)


def _ref_loss(pred, tgt):
    n = tgt.shape[0]
    loss_bbox = jnp.sum(jnp.abs(pred - tgt)) / n
    p = _ref_c2c(pred)
    t = _ref_c2c(tgt)
    area_p = (p[:, 2] - p[:, 0]) * (p[:, 3] - p[:, 1])
    area_t = (t[:, 2] - t[:, 0]) * (t[:, 3] - t[:, 1])
    iw = jnp.clip(jnp.minimum(p[:, 2], t[:, 2]) - jnp.maximum(p[:, 0], t[:, 0]), 0.0)
    ih = jnp.clip(jnp.minimum(p[:, 3], t[:, 3]) - jnp.maximum(p[:, 1], t[:, 1]), 0.0)
    inter = iw * ih
    union = area_p + area_t - inter
    iou = inter / union
    ew = jnp.clip(jnp.maximum(p[:, 2], t[:, 2]) - jnp.minimum(p[:, 0], t[:, 0]), 0.0)
    eh = jnp.clip(jnp.maximum(p[:, 3], t[:, 3]) - jnp.minimum(p[:, 1], t[:, 1]), 0.0)
    enclose = ew * eh
    giou = iou - (enclose - union) / enclose
    loss_giou = jnp.sum(1.0 - giou) / n
    return loss_bbox, loss_giou


if __name__ == "__main__":
    key = jax.random.PRNGKey(0)

    def make_boxes(k, n):
        k1, k2 = jax.random.split(k)
        centers = jax.random.uniform(k1, (n, 2), minval=0.3, maxval=0.7)
        sizes = jax.random.uniform(k2, (n, 2), minval=0.1, maxval=0.3)
        return jnp.concatenate([centers, sizes], axis=-1).astype(jnp.float32)

    k1, k2, k3, k4 = jax.random.split(key, 4)
    # Small case (8 box pairs) + a multi-chunk case exercising masking/accumulation.
    for kp, kt, n in [(k1, k2, 8), (k3, k4, 5000)]:
        pred_boxes = make_boxes(kp, n)
        target_boxes = make_boxes(kt, n)
        losses = box_decoder_loss(pred_boxes, target_boxes, target_slices=None)
        jax.block_until_ready(losses)

        ref_bbox, ref_giou = _ref_loss(pred_boxes, target_boxes)
        assert jnp.allclose(losses["loss_bbox"], ref_bbox, rtol=1e-4, atol=1e-5), (
            n, losses["loss_bbox"], ref_bbox)
        assert jnp.allclose(losses["loss_giou"], ref_giou, rtol=1e-4, atol=1e-5), (
            n, losses["loss_giou"], ref_giou)

    print("KERNEL_OK")
</pallas_src>

<mosaic_0001>
module attributes {stable_mosaic.version = 11 : i64} {
  func.func @_box_loss_kernel(%arg0: i32, %arg1: i32, %arg2: memref<1xi32, #tpu.memory_space<smem>>, %arg3: memref<1xf32, #tpu.memory_space<smem>>, %arg4: memref<8x64x128xf32, #tpu.memory_space<vmem>>, %arg5: memref<8x128xf32, #tpu.memory_space<vmem>>, %arg6: memref<64x128xf32, #tpu.memory_space<vmem>>, %arg7: memref<64x128xf32, #tpu.memory_space<vmem>>) attributes {dimension_semantics = [#tpu.dimension_semantics<parallel>, #tpu.dimension_semantics<arbitrary>], iteration_bounds = array<i64: 2, 1>, scalar_prefetch = 0 : i64, scratch_operands = 2 : i64, tpu.core_type = #tpu.core_type<tc>, window_params = [{transform_indices = @transform_0, window_bounds = array<i64: 1>}, {transform_indices = @transform_1, window_bounds = array<i64: 1>}, {transform_indices = @transform_2, window_bounds = array<i64: 8, 64, 128>}, {transform_indices = @transform_3, window_bounds = array<i64: 8, 128>}]} {
    %c0_i32 = arith.constant 0 : i32
    %0 = arith.cmpi eq, %arg1, %c0_i32 : i32
    %1 = arith.extui %0 : i1 to i32
    %c0_i32_0 = arith.constant 0 : i32
    %2 = arith.cmpi ne, %1, %c0_i32_0 : i32
    scf.if %2 {
      %cst_42 = arith.constant 0.000000e+00 : f32
      %118 = vector.broadcast %cst_42 : f32 to vector<64x128xf32>
      %c0_43 = arith.constant 0 : index
      %c0_44 = arith.constant 0 : index
      %119 = vector.load %arg6[%c0_43, %c0_44] : memref<64x128xf32, #tpu.memory_space<vmem>>, vector<64x128xf32>
      tpu.vector_store %arg6[%c0_43, %c0_44], %118 {strides = array<i32>} : memref<64x128xf32, #tpu.memory_space<vmem>>, vector<64x128xf32>,
      %cst_45 = arith.constant 0.000000e+00 : f32
      %120 = vector.broadcast %cst_45 : f32 to vector<64x128xf32>
      %c0_46 = arith.constant 0 : index
      %c0_47 = arith.constant 0 : index
      %121 = vector.load %arg7[%c0_46, %c0_47] : memref<64x128xf32, #tpu.memory_space<vmem>>, vector<64x128xf32>
      tpu.vector_store %arg7[%c0_46, %c0_47], %120 {strides = array<i32>} : memref<64x128xf32, #tpu.memory_space<vmem>>, vector<64x128xf32>,
    } else {
    }
    %c0 = arith.constant 0 : index
    %c0_1 = arith.constant 0 : index
    %c0_2 = arith.constant 0 : index
    %3 = vector.load %arg4[%c0, %c0_1, %c0_2] : memref<8x64x128xf32, #tpu.memory_space<vmem>>, vector<1x64x128xf32>
    %4 = vector.shape_cast %3 : vector<1x64x128xf32> to vector<64x128xf32>
    %c1 = arith.constant 1 : index
    %c0_3 = arith.constant 0 : index
    %c0_4 = arith.constant 0 : index
    %5 = vector.load %arg4[%c1, %c0_3, %c0_4] : memref<8x64x128xf32, #tpu.memory_space<vmem>>, vector<1x64x128xf32>
    %6 = vector.shape_cast %5 : vector<1x64x128xf32> to vector<64x128xf32>
    %c2 = arith.constant 2 : index
    %c0_5 = arith.constant 0 : index
    %c0_6 = arith.constant 0 : index
    %7 = vector.load %arg4[%c2, %c0_5, %c0_6] : memref<8x64x128xf32, #tpu.memory_space<vmem>>, vector<1x64x128xf32>
    %8 = vector.shape_cast %7 : vector<1x64x128xf32> to vector<64x128xf32>
    %c3 = arith.constant 3 : index
    %c0_7 = arith.constant 0 : index
    %c0_8 = arith.constant 0 : index
    %9 = vector.load %arg4[%c3, %c0_7, %c0_8] : memref<8x64x128xf32, #tpu.memory_space<vmem>>, vector<1x64x128xf32>
    %10 = vector.shape_cast %9 : vector<1x64x128xf32> to vector<64x128xf32>
    %c4 = arith.constant 4 : index
    %c0_9 = arith.constant 0 : index
    %c0_10 = arith.constant 0 : index
    %11 = vector.load %arg4[%c4, %c0_9, %c0_10] : memref<8x64x128xf32, #tpu.memory_space<vmem>>, vector<1x64x128xf32>
    %12 = vector.shape_cast %11 : vector<1x64x128xf32> to vector<64x128xf32>
    %c5 = arith.constant 5 : index
    %c0_11 = arith.constant 0 : index
    %c0_12 = arith.constant 0 : index
    %13 = vector.load %arg4[%c5, %c0_11, %c0_12] : memref<8x64x128xf32, #tpu.memory_space<vmem>>, vector<1x64x128xf32>
    %14 = vector.shape_cast %13 : vector<1x64x128xf32> to vector<64x128xf32>
    %c6 = arith.constant 6 : index
    %c0_13 = arith.constant 0 : index
    %c0_14 = arith.constant 0 : index
    %15 = vector.load %arg4[%c6, %c0_13, %c0_14] : memref<8x64x128xf32, #tpu.memory_space<vmem>>, vector<1x64x128xf32>
    %16 = vector.shape_cast %15 : vector<1x64x128xf32> to vector<64x128xf32>
    %c7 = arith.constant 7 : index
    %c0_15 = arith.constant 0 : index
    %c0_16 = arith.constant 0 : index
    %17 = vector.load %arg4[%c7, %c0_15, %c0_16] : memref<8x64x128xf32, #tpu.memory_space<vmem>>, vector<1x64x128xf32>
    %18 = vector.shape_cast %17 : vector<1x64x128xf32> to vector<64x128xf32>
    %c1_i32 = arith.constant 1 : i32
    %19 = arith.muli %arg0, %c1_i32 : i32
    %20 = arith.addi %19, %arg1 : i32
    %c8192_i32 = arith.constant 8192 : i32
    %21 = arith.muli %20, %c8192_i32 : i32
    %22 = tpu.iota {dimensions = array<i32: 0>} : vector<64x128xi32>
    %23 = tpu.iota {dimensions = array<i32: 1>} : vector<64x128xi32>
    %c128_i32 = arith.constant 128 : i32
    %24 = vector.broadcast %c128_i32 : i32 to vector<64x128xi32>
    %25 = arith.muli %22, %24 : vector<64x128xi32>
    %26 = vector.broadcast %21 : i32 to vector<64x128xi32>
    %27 = arith.addi %26, %25 : vector<64x128xi32>
    %28 = arith.addi %27, %23 : vector<64x128xi32>
    %c0_17 = arith.constant 0 : index
    %29 = memref.load %arg2[%c0_17] : memref<1xi32, #tpu.memory_space<smem>>
    %30 = vector.broadcast %29 : i32 to vector<64x128xi32>
    %31 = arith.cmpi slt, %28, %30 : vector<64x128xi32>
    %32 = arith.subf %4, %12 : vector<64x128xf32>
    %33 = math.absf %32 : vector<64x128xf32>
    %34 = arith.subf %6, %14 : vector<64x128xf32>
    %35 = math.absf %34 : vector<64x128xf32>
    %36 = arith.addf %33, %35 : vector<64x128xf32>
    %37 = arith.subf %8, %16 : vector<64x128xf32>
    %38 = math.absf %37 : vector<64x128xf32>
    %39 = arith.addf %36, %38 : vector<64x128xf32>
    %40 = arith.subf %10, %18 : vector<64x128xf32>
    %41 = math.absf %40 : vector<64x128xf32>
    %42 = arith.addf %39, %41 : vector<64x128xf32>
    %cst = arith.constant 5.000000e-01 : f32
    %43 = vector.broadcast %cst : f32 to vector<64x128xf32>
    %44 = arith.mulf %43, %8 : vector<64x128xf32>
    %45 = arith.subf %4, %44 : vector<64x128xf32>
    %cst_18 = arith.constant 5.000000e-01 : f32
    %46 = vector.broadcast %cst_18 : f32 to vector<64x128xf32>
    %47 = arith.mulf %46, %10 : vector<64x128xf32>
    %48 = arith.subf %6, %47 : vector<64x128xf32>
    %cst_19 = arith.constant 5.000000e-01 : f32
    %49 = vector.broadcast %cst_19 : f32 to vector<64x128xf32>
    %50 = arith.mulf %49, %8 : vector<64x128xf32>
    %51 = arith.addf %4, %50 : vector<64x128xf32>
    %cst_20 = arith.constant 5.000000e-01 : f32
    %52 = vector.broadcast %cst_20 : f32 to vector<64x128xf32>
    %53 = arith.mulf %52, %10 : vector<64x128xf32>
    %54 = arith.addf %6, %53 : vector<64x128xf32>
    %cst_21 = arith.constant 5.000000e-01 : f32
    %55 = vector.broadcast %cst_21 : f32 to vector<64x128xf32>
    %56 = arith.mulf %55, %16 : vector<64x128xf32>
    %57 = arith.subf %12, %56 : vector<64x128xf32>
    %cst_22 = arith.constant 5.000000e-01 : f32
    %58 = vector.broadcast %cst_22 : f32 to vector<64x128xf32>
    %59 = arith.mulf %58, %18 : vector<64x128xf32>
    %60 = arith.subf %14, %59 : vector<64x128xf32>
    %cst_23 = arith.constant 5.000000e-01 : f32
    %61 = vector.broadcast %cst_23 : f32 to vector<64x128xf32>
    %62 = arith.mulf %61, %16 : vector<64x128xf32>
    %63 = arith.addf %12, %62 : vector<64x128xf32>
    %cst_24 = arith.constant 5.000000e-01 : f32
    %64 = vector.broadcast %cst_24 : f32 to vector<64x128xf32>
    %65 = arith.mulf %64, %18 : vector<64x128xf32>
    %66 = arith.addf %14, %65 : vector<64x128xf32>
    %67 = arith.subf %51, %45 : vector<64x128xf32>
    %68 = arith.subf %54, %48 : vector<64x128xf32>
    %69 = arith.mulf %67, %68 : vector<64x128xf32>
    %70 = arith.subf %63, %57 : vector<64x128xf32>
    %71 = arith.subf %66, %60 : vector<64x128xf32>
    %72 = arith.mulf %70, %71 : vector<64x128xf32>
    %73 = arith.minimumf %51, %63 : vector<64x128xf32>
    %74 = arith.maximumf %45, %57 : vector<64x128xf32>
    %75 = arith.subf %73, %74 : vector<64x128xf32>
    %cst_25 = arith.constant 0.000000e+00 : f32
    %76 = vector.broadcast %cst_25 : f32 to vector<64x128xf32>
    %77 = arith.maximumf %75, %76 : vector<64x128xf32>
    %78 = arith.minimumf %54, %66 : vector<64x128xf32>
    %79 = arith.maximumf %48, %60 : vector<64x128xf32>
    %80 = arith.subf %78, %79 : vector<64x128xf32>
    %cst_26 = arith.constant 0.000000e+00 : f32
    %81 = vector.broadcast %cst_26 : f32 to vector<64x128xf32>
    %82 = arith.maximumf %80, %81 : vector<64x128xf32>
    %83 = arith.mulf %77, %82 : vector<64x128xf32>
    %84 = arith.addf %69, %72 : vector<64x128xf32>
    %85 = arith.subf %84, %83 : vector<64x128xf32>
    %86 = tpu.reciprocal %85 : vector<64x128xf32> -> vector<64x128xf32>
    %87 = arith.mulf %83, %86 : vector<64x128xf32>
    %88 = arith.maximumf %51, %63 : vector<64x128xf32>
    %89 = arith.minimumf %45, %57 : vector<64x128xf32>
    %90 = arith.subf %88, %89 : vector<64x128xf32>
    %cst_27 = arith.constant 0.000000e+00 : f32
    %91 = vector.broadcast %cst_27 : f32 to vector<64x128xf32>
    %92 = arith.maximumf %90, %91 : vector<64x128xf32>
    %93 = arith.maximumf %54, %66 : vector<64x128xf32>
    %94 = arith.minimumf %48, %60 : vector<64x128xf32>
    %95 = arith.subf %93, %94 : vector<64x128xf32>
    %cst_28 = arith.constant 0.000000e+00 : f32
    %96 = vector.broadcast %cst_28 : f32 to vector<64x128xf32>
    %97 = arith.maximumf %95, %96 : vector<64x128xf32>
    %98 = arith.mulf %92, %97 : vector<64x128xf32>
    %99 = arith.subf %98, %85 : vector<64x128xf32>
    %100 = tpu.reciprocal %98 : vector<64x128xf32> -> vector<64x128xf32>
    %101 = arith.mulf %99, %100 : vector<64x128xf32>
    %102 = arith.subf %87, %101 : vector<64x128xf32>
    %c0_29 = arith.constant 0 : index
    %c0_30 = arith.constant 0 : index
    %103 = vector.load %arg6[%c0_29, %c0_30] : memref<64x128xf32, #tpu.memory_space<vmem>>, vector<64x128xf32>
    %cst_31 = arith.constant 0.000000e+00 : f32
    %104 = vector.broadcast %cst_31 : f32 to vector<64x128xf32>
    %105 = arith.select %31, %42, %104 : vector<64x128xi1>, vector<64x128xf32>
    %106 = arith.addf %103, %105 : vector<64x128xf32>
    %c0_32 = arith.constant 0 : index
    %c0_33 = arith.constant 0 : index
    %107 = vector.load %arg6[%c0_32, %c0_33] : memref<64x128xf32, #tpu.memory_space<vmem>>, vector<64x128xf32>
    tpu.vector_store %arg6[%c0_32, %c0_33], %106 {strides = array<i32>} : memref<64x128xf32, #tpu.memory_space<vmem>>, vector<64x128xf32>,
    %c0_34 = arith.constant 0 : index
    %c0_35 = arith.constant 0 : index
    %108 = vector.load %arg7[%c0_34, %c0_35] : memref<64x128xf32, #tpu.memory_space<vmem>>, vector<64x128xf32>
    %cst_36 = arith.constant 1.000000e+00 : f32
    %109 = vector.broadcast %cst_36 : f32 to vector<64x128xf32>
    %110 = arith.subf %109, %102 : vector<64x128xf32>
    %cst_37 = arith.constant 0.000000e+00 : f32
    %111 = vector.broadcast %cst_37 : f32 to vector<64x128xf32>
    %112 = arith.select %31, %110, %111 : vector<64x128xi1>, vector<64x128xf32>
    %113 = arith.addf %108, %112 : vector<64x128xf32>
    %c0_38 = arith.constant 0 : index
    %c0_39 = arith.constant 0 : index
    %114 = vector.load %arg7[%c0_38, %c0_39] : memref<64x128xf32, #tpu.memory_space<vmem>>, vector<64x128xf32>
    tpu.vector_store %arg7[%c0_38, %c0_39], %113 {strides = array<i32>} : memref<64x128xf32, #tpu.memory_space<vmem>>, vector<64x128xf32>,
    %c0_i32_40 = arith.constant 0 : i32
    %115 = arith.cmpi eq, %arg1, %c0_i32_40 : i32
    %116 = arith.extui %115 : i1 to i32
    %c0_i32_41 = arith.constant 0 : i32
    %117 = arith.cmpi ne, %116, %c0_i32_41 : i32
    scf.if %117 {
      %c0_42 = arith.constant 0 : index
      %118 = memref.load %arg3[%c0_42] : memref<1xf32, #tpu.memory_space<smem>>
      %c0_43 = arith.constant 0 : index
      %c0_44 = arith.constant 0 : index
      %119 = vector.load %arg6[%c0_43, %c0_44] : memref<64x128xf32, #tpu.memory_space<vmem>>, vector<64x128xf32>
      %120 = vector.shape_cast %119 : vector<64x128xf32> to vector<1x64x128xf32>
      %cst_45 = arith.constant dense<0.000000e+00> : vector<1xf32>
      %121 = vector.multi_reduction <add>, %120, %cst_45 [1, 2] : vector<1x64x128xf32> to vector<1xf32>
      %122 = vector.shape_cast %121 : vector<1xf32> to vector<1x1x1xf32>
      %123 = vector.extract %122[0, 0, 0] : f32 from vector<1x1x1xf32>
      %124 = vector.broadcast %123 : f32 to vector<1x1xf32>
      %125 = vector.broadcast %118 : f32 to vector<1x1xf32>
      %126 = arith.mulf %124, %125 : vector<1x1xf32>
      %c0_46 = arith.constant 0 : index
      %c0_47 = arith.constant 0 : index
      %127 = vector.load %arg7[%c0_46, %c0_47] : memref<64x128xf32, #tpu.memory_space<vmem>>, vector<64x128xf32>
      %128 = vector.shape_cast %127 : vector<64x128xf32> to vector<1x64x128xf32>
      %cst_48 = arith.constant dense<0.000000e+00> : vector<1xf32>
      %129 = vector.multi_reduction <add>, %128, %cst_48 [1, 2] : vector<1x64x128xf32> to vector<1xf32>
      %130 = vector.shape_cast %129 : vector<1xf32> to vector<1x1x1xf32>
      %131 = vector.extract %130[0, 0, 0] : f32 from vector<1x1x1xf32>
      %132 = vector.broadcast %131 : f32 to vector<1x1xf32>
      %133 = vector.broadcast %118 : f32 to vector<1x1xf32>
      %134 = arith.mulf %132, %133 : vector<1x1xf32>
      %135 = tpu.iota {dimensions = array<i32: 0>} : vector<8x128xi32>
      %136 = tpu.iota {dimensions = array<i32: 1>} : vector<8x128xi32>
      %c0_i32_49 = arith.constant 0 : i32
      %137 = vector.broadcast %c0_i32_49 : i32 to vector<8x128xi32>
      %138 = arith.cmpi eq, %135, %137 : vector<8x128xi32>
      %c0_i32_50 = arith.constant 0 : i32
      %139 = vector.broadcast %c0_i32_50 : i32 to vector<8x128xi32>
      %140 = arith.cmpi eq, %136, %139 : vector<8x128xi32>
      %141 = arith.andi %138, %140 : vector<8x128xi1>
      %cst_51 = arith.constant 0.000000e+00 : f32
      %142 = vector.shape_cast %126 : vector<1x1xf32> to vector<1x1xf32>
      %143 = vector.broadcast %142 : vector<1x1xf32> to vector<8x128xf32>
      %144 = vector.broadcast %cst_51 : f32 to vector<8x128xf32>
      %145 = arith.select %141, %143, %144 : vector<8x128xi1>, vector<8x128xf32>
      %c0_i32_52 = arith.constant 0 : i32
      %146 = vector.broadcast %c0_i32_52 : i32 to vector<8x128xi32>
      %147 = arith.cmpi eq, %135, %146 : vector<8x128xi32>
      %c1_i32_53 = arith.constant 1 : i32
      %148 = vector.broadcast %c1_i32_53 : i32 to vector<8x128xi32>
      %149 = arith.cmpi eq, %136, %148 : vector<8x128xi32>
      %150 = arith.andi %147, %149 : vector<8x128xi1>
      %151 = vector.shape_cast %134 : vector<1x1xf32> to vector<1x1xf32>
      %152 = vector.broadcast %151 : vector<1x1xf32> to vector<8x128xf32>
      %153 = arith.select %150, %152, %145 : vector<8x128xi1>, vector<8x128xf32>
      %c0_54 = arith.constant 0 : index
      %c0_55 = arith.constant 0 : index
      %154 = vector.load %arg5[%c0_54, %c0_55] : memref<8x128xf32, #tpu.memory_space<vmem>>, vector<8x128xf32>
      tpu.vector_store %arg5[%c0_54, %c0_55], %153 {strides = array<i32>} : memref<8x128xf32, #tpu.memory_space<vmem>>, vector<8x128xf32>,
    } else {
    }
    return
  }
  func.func @transform_0(%arg0: i32, %arg1: i32) -> i32 {
    %c0_i32 = arith.constant 0 : i32
    %c0_i32_0 = arith.constant 0 : i32
    return %c0_i32 : i32
  }
  func.func @transform_1(%arg0: i32, %arg1: i32) -> i32 {
    %c0_i32 = arith.constant 0 : i32
    %c0_i32_0 = arith.constant 0 : i32
    return %c0_i32 : i32
  }
  func.func @transform_2(%arg0: i32, %arg1: i32) -> (i32, i32, i32) {
    %c1_i32 = arith.constant 1 : i32
    %0 = arith.muli %arg0, %c1_i32 : i32
    %1 = arith.addi %0, %arg1 : i32
    %c0_i32 = arith.constant 0 : i32
    %c0_i32_0 = arith.constant 0 : i32
    %c0_i32_1 = arith.constant 0 : i32
    return %c0_i32, %1, %c0_i32_0 : i32, i32, i32
  }
  func.func @transform_3(%arg0: i32, %arg1: i32) -> (i32, i32) {
    %c0_i32 = arith.constant 0 : i32
    %c0_i32_0 = arith.constant 0 : i32
    return %arg0, %c0_i32 : i32, i32
  }
}

</mosaic_0001>

<bundles_post_ra>
// kernel: tpu_custom_call.1
= control target key start
LH: loop header
LB: loop body
LE: loop exit
PB: predicated region body
PF: predicated region fallthrough
CT: control target
= control target key end

     0   :  { %s2460_s0 = inlined_call_operand.<no memory space> [shape: s32[1], index: 0, kind: input, shape index: {}]   ;;  %s2461_s1 = inlined_call_operand.<no memory space> [shape: f32[1], index: 1, kind: input, shape index: {}]   ;;  %s2462_s2 = inlined_call_operand.hbm [shape: f32[8,128,128], index: 2, kind: input, shape index: {}]   ;;  %s2463_s3 = inlined_call_operand.hbm [shape: f32[16,128], index: 3, kind: output, shape index: {}]  }
   0x1   :  { %8 = sst [smem:[#allocation4]] %s2460_s0 }
   0x2   :  { %9 = sst [smem:[#allocation5]] %s2461_s1 }
   0x3   :  { %10 = vsyncpa [#allocation7], 0 }
   0x4   :  { %12 = vsyncpa [#allocation7 + $0x1], 0 }
   0x5   :  { %13 = vsyncpa [#allocation8], 0 }
   0x6   :  { %15 = vsyncpa [#allocation8 + $0x1], 0  ;;  %s1337_s16 = smov 0   ;;  %s1339_s17 = smov 0  }
   0x7   :  { %s1341_s18 = smov 0   ;;  %s1343_s19 = smov 0  }
   0x8   :  { %s1345_s20 = smov 0   ;;  %s1347_s21 = smov 0  }
   0x9 LB: > { %s1042_s0 = sadd.s32 4294967295, %s1303_s21   ;;  %s1043_s1 = sadd.s32 4294967294, %s1303_s21   ;;  %s1303_s21 = sphi %s1347_s21, %s21_s21   ;;  %s1299_s20 = sphi %s1345_s20, %s3007_s20   ;;  %s1295_s19 = sphi %s1343_s19, %s3006_s19   ;;  %s1291_s18 = sphi %s1341_s18, %s3005_s18   ;;  %s1287_s17 = sphi %s1339_s17, %s3004_s17   ;;  %s1283_s16 = sphi %s1337_s16, %s3003_s16  }
   0xa   : > { %s33_s22 = sadd.s32 1, %s1299_s20  ;;  %s84_s23 = sadd.s32 1, %s1291_s18 }
   0xb   : > { %p35_p0 = scmp.ge.s32.totalorder %s33_s22, 2  ;;  %p91_p1 = scmp.ne.s32.totalorder %s1291_s18, %s1287_s17 }
   0xc   : > { %p92_p2 = scmp.eq.s32.totalorder %s1303_s21, 0  ;;  %p97_p3 = scmp.ne.s32.totalorder %s1287_s17, %s1283_s16 }
   0xd   : > { %s3009_s22 = smov (%p35_p0, %s33_s22), 0  ;;  %p98_p5 = scmp.eq.s32.totalorder %s1042_s0, 0 }
   0xe   : > { %p1378_p4 = por %p92_p2, %p91_p1  ;;  %s81_s25 = ssub.s32 %s1299_s20, %s3009_s22 }
   0xf   : > { %p121_p6 = scmp.eq.s32.totalorder %s1042_s0, 1  ;;  %p82_p7 = scmp.eq.s32.totalorder %s81_s25, 0 }
  0x10   : > { %p1384_p8 = por %p98_p5, %p97_p3  ;;  %p127_p10 = scmp.eq.s32.totalorder %s1043_s1, 1 }
  0x11   : > { %p1388_p9 = por %p121_p6, %p91_p1  ;;  %p1045_p12 = scmp.ge.s32.totalorder %s1303_s21, 2 }
  0x12   : > { %s1393_s28 = scalar_select %p82_p7, %s1291_s18, %s84_s23  }
  0x13   : > { %p1395_p11 = por %p127_p10, %p97_p3  ;;  %149 = sbr.rel (%p1045_p12) target bundleno = 39 (0x27), region = 24 }
  0x1a   : > { %s153_s30 = sand.u32 1, %s1291_s18   ;;  %s1115_s5 = sshll.u32 %s1299_s20, 10 }
  0x1b   : > { %s1046_s4 = sshll.u32 %s153_s30, 9  ;;  %s164_s9 = scalar_lea.hbm %s2462_s2, %s1115_s5 }
  0x1c   : > { %s1120_s6 = scalar_select %p1378_p4, [#allocation0], [#allocation12] }
  0x1d   : > { %s157_s11 = scalar_lea.vmem [#allocation6], %s1046_s4  ;;  %s1305_s13 = smov 2048  }
  0x1e   : > { %s169_s10 = sld [smem:[%s1120_s6]]   ;;  %s177_s12 = sshll.u32 %s157_s11, 4  ;;  %s178_s12 = int_to_ptr.vmem [resolvable:$true] %s177_s12 }
  0x1f   : > { %1121 = sst [smem:[#allocation11]] (%p1378_p4), %s1305_s13  ;;  %s1306_s14 = smov 1024  }
  0x20   : > { %1122 = sst [smem:[#allocation11 + $0x1]] (%p1378_p4), %s1306_s14  ;;  %s1307_s15 = smov 8  }
  0x21   : > { %1123 = sst [smem:[#allocation11 + $0x2]] (%p1378_p4), %s1307_s15  ;;  %s1308_s0 = smov 128  }
  0x22   : > { %1124 = sst [smem:[#allocation11 + $0x3]] (%p1378_p4), %s1308_s0  ;;  %s154_s25 = scalar_lea.sflag [#allocation7], %s153_s30 }
  0x23   : > { %1125 = sst [smem:[#allocation11 + $0x4]] (%p1378_p4), %s1308_s0  ;;  %s1309_s4 = smov [#allocation10]  }
  0x24   : > { %s1049_s1 = sshll.u32 %s169_s10, 26  ;;  %1126 = sst [smem:[#allocation11 + $0x5]] (%p1378_p4), %s1307_s15 }
  0x25   : > { %s1050_s23 = sadd.s32 134217728, %s1049_s1 }
  0x26   : > { %1127 = dma.general (%p1378_p4), %s164_s9, 8192, %s178_s12, %s154_s25, %s1309_s4, [#allocation11], %s1050_s23, 0  }
  0x27 PF: > { %p1051_p13 = scmp.ge.s32.totalorder %s1303_s21, 1  ;;  %p198_p0 = scmp.lt.s32.totalorder %s1303_s21, 3 }
  0x29   : > { %p199_p1 = pnand %p1051_p13, %p198_p0 }
  0x2b   : > { %202 = sbr.rel (%p199_p1) target bundleno = 441 (0x1b9), region = 32 }
  0x32   : > { %s1426_s5 = sand.u32 1, %s1287_s17  }
  0x33   : > { %s1052_s6 = sshll.u32 %s1426_s5, 9  ;;  %s205_s7 = scalar_lea.sflag [#allocation7], %s1426_s5 }
  0x34   : > { %s1430_s8 = scalar_lea.vmem [#allocation6], %s1052_s6 }
  0x35   : > { %1274 = dma.done.wait (%p1384_p8), %s205_s7, 8192  }
  0x36   : > { %1276 = vsyncadd (%p1384_p8), %s205_s7, 4294959104  ;;  %v326_v0 = vlaneseq  ;;  %s1110_s24 = sshll.u32 %s1295_s19, 13  ;;  %s362_s26 = sld [smem:[#allocation4]]  ;;  %v1450_v21 = vld [vmem:[%s1430_s8 + $0x80] sm:$0xff]  ;;  %v1453_v23 = vld [vmem:[%s1430_s8 + $0x88] sm:$0xff] }
  0x37   : > { %v345_v12 = vstv %s1110_s24  ;;  %v1456_v24 = vld [vmem:[%s1430_s8 + $0x90] sm:$0xff]  ;;  %v1459_v25 = vld [vmem:[%s1430_s8 + $0x98] sm:$0xff]  ;;  %v1462_v27 = vld [vmem:[%s1430_s8 + $0xa0] sm:$0xff]  ;;  %v1482_v38 = vmul.f32 0.5, %v1450_v21  ;;  %v1497_v43 = vmul.f32 0.5, %v1453_v23  ;;  %s887_s30 = sld [smem:[#allocation5]] }
  0x38   : > { %v1436_v1 = vshrl.u32 %v326_v0, 7  ;;  %v1447_v17 = vand.u32 127, %v326_v0  ;;  %v1465_v28 = vld [vmem:[%s1430_s8 + $0xa8] sm:$0xff]  ;;  %v1468_v29 = vld [vmem:[%s1430_s8 + $0xb0] sm:$0xff]  ;;  %v1473_v34 = vld [vmem:[%s1430_s8 + $0xb8] sm:$0xff]  ;;  %v1500_v44 = vmul.f32 0.5, %v1456_v24 }
  0x39   : > { %v1485_v39 = vld [vmem:[%s1430_s8] sm:$0xff]  ;;  %v1488_v40 = vld [vmem:[%s1430_s8 + $0x8] sm:$0xff]  ;;  %v1491_v41 = vld [vmem:[%s1430_s8 + $0x10] sm:$0xff]  ;;  %v1503_v45 = vmul.f32 0.5, %v1459_v25  ;;  %v1518_v50 = vmul.f32 0.5, %v1462_v27  ;;  %v1521_v51 = vmul.f32 0.5, %v1465_v28 }
  0x3a   : > { %2640 = vst [vmem:[#allocation15_spill] sm:$0xff] %v1436_v1  ;;  %v328_v2 = vadd.s32 8, %v1436_v1  ;;  %v329_v3 = vadd.s32 16, %v1436_v1  ;;  %v330_v4 = vadd.s32 24, %v1436_v1  ;;  %v331_v5 = vadd.s32 32, %v1436_v1  ;;  %2641 = vst [vmem:[#allocation16_spill] sm:$0xff] %v1447_v17 }
  0x3b   : > { %v332_v6 = vadd.s32 40, %v1436_v1  ;;  %v333_v7 = vadd.s32 48, %v1436_v1  ;;  %v334_v8 = vadd.s32 56, %v1436_v1  ;;  %v337_v9 = vmul.u32 128, %v1436_v1  ;;  %2645 = vst [vmem:[#allocation20_spill] sm:$0xff] %v1491_v41  ;;  %2647 = vst [vmem:[#allocation22_spill] sm:$0xff] %v1500_v44 }
  0x3c   : > { %v338_v10 = vmul.u32 128, %v328_v2  ;;  %v339_v11 = vmul.u32 128, %v329_v3  ;;  %v1470_v33 = vstv %s362_s26  ;;  %2648 = vst [vmem:[#allocation23_spill] sm:$0xff] %v1503_v45  ;;  %v1506_v46 = vld [vmem:[%s1430_s8 + $0x18] sm:$0xff]  ;;  %v1509_v47 = vld [vmem:[%s1430_s8 + $0x20] sm:$0xff]  ;;  %v1512_v48 = vld [vmem:[%s1430_s8 + $0x28] sm:$0xff]  ;;  %v1565_v3 = vsub.f32 %v1485_v39, %v1482_v38 }
  0x3d   : > { %v340_v13 = vmul.u32 128, %v330_v4  ;;  %v341_v14 = vmul.u32 128, %v331_v5  ;;  %v346_v19 = vadd.s32 %v345_v12, %v337_v9  ;;  %2642 = vst [vmem:[#allocation17_spill] sm:$0xff] %v1470_v33  ;;  %2649 = vst [vmem:[#allocation24_spill] sm:$0xff] %v1506_v46  ;;  %v1524_v52 = vmul.f32 0.5, %v1468_v29  ;;  %v1527_v53 = vld [vmem:[%s1430_s8 + $0x30] sm:$0xff] }
  0x3e   : > { %v342_v15 = vmul.u32 128, %v332_v6  ;;  %v343_v16 = vmul.u32 128, %v333_v7  ;;  %v347_v20 = vadd.s32 %v345_v12, %v338_v10  ;;  %v348_v22 = vadd.s32 %v345_v12, %v339_v11  ;;  %2650 = vst [vmem:[#allocation25_spill] sm:$0xff] %v1509_v47  ;;  %2651 = vst [vmem:[#allocation26_spill] sm:$0xff] %v1512_v48  ;;  %v1530_v54 = vld [vmem:[%s1430_s8 + $0x100] sm:$0xff]  ;;  %v1533_v55 = vld [vmem:[%s1430_s8 + $0x108] sm:$0xff] }
  0x3f   : > { %v344_v18 = vmul.u32 128, %v334_v8  ;;  %v349_v26 = vadd.s32 %v345_v12, %v340_v13  ;;  %v350_v30 = vadd.s32 %v345_v12, %v341_v14  ;;  %v1476_v36 = vadd.s32 %v346_v19, %v1447_v17  ;;  %2653 = vst [vmem:[#allocation28_spill] sm:$0xff] %v1518_v50  ;;  %2654 = vst [vmem:[#allocation29_spill] sm:$0xff] %v1521_v51  ;;  %v1548_v60 = vld [vmem:[%s1430_s8 + $0x38] sm:$0xff]  ;;  %v1551_v61 = vld [vmem:[%s1430_s8 + $0xc0] sm:$0xff]  ;;  %s1053_s10 = sshll.u32 %s1426_s5, 3 }
  0x40   : > { %v351_v31 = vadd.s32 %v345_v12, %v342_v15  ;;  %v352_v32 = vadd.s32 %v345_v12, %v343_v16  ;;  %v1479_v37 = vadd.s32 %v347_v20, %v1447_v17  ;;  %v1494_v42 = vadd.s32 %v348_v22, %v1447_v17  ;;  %2655 = vst [vmem:[#allocation30_spill] sm:$0xff] %v1524_v52  ;;  %v1554_v62 = vld [vmem:[%s1430_s8 + $0x110] sm:$0xff]  ;;  %v1568_v4 = vld [vmem:[%s1430_s8 + $0x118] sm:$0xff]  ;;  %v1585_v9 = vld [vmem:[%s1430_s8 + $0x40] sm:$0xff]  ;;  %s1112_s11 = sshll.u32 %s1295_s19, 7  ;;  %s230_s13 = scalar_lea.vmem [#allocation9], %s1053_s10 }
  0x41   : > { %v353_v35 = vadd.s32 %v345_v12, %v344_v18  ;;  %2643 = vst [vmem:[#allocation18_spill] sm:$0xff] %v1476_v36  ;;  %v1515_v49 = vadd.s32 %v349_v26, %v1447_v17  ;;  %2656 = vst [vmem:[#allocation31_spill] sm:$0xff] %v1527_v53  ;;  %v1536_v56 = vadd.s32 %v350_v30, %v1447_v17  ;;  %v1545_v59 = vmul.f32 0.5, %v1473_v34  ;;  %v1588_v10 = vld [vmem:[%s1430_s8 + $0x48] sm:$0xff]  ;;  %v1591_v11 = vld [vmem:[%s1430_s8 + $0x50] sm:$0xff]  ;;  %s963_s14 = sshll.u32 %s230_s13, 4  ;;  %s2411_s1 = scalar_lea.hbm %s2463_s3, %s1112_s11  ;;  %s2413_s14 = int_to_ptr.vmem [resolvable:$true] %s963_s14 }
  0x42   : > { %2644 = vst [vmem:[#allocation19_spill] sm:$0xff] %v1479_v37  ;;  %2646 = vst [vmem:[#allocation21_spill] sm:$0xff] %v1494_v42  ;;  %v1539_v57 = vadd.s32 %v351_v31, %v1447_v17  ;;  %v1542_v58 = vadd.s32 %v352_v32, %v1447_v17  ;;  %v372_v0 = vsub.f32 %v1485_v39, %v1530_v54  ;;  %v1594_v12 = vld [vmem:[%s1430_s8 + $0x120] sm:$0xff]  ;;  %v1597_v13 = vld [vmem:[%s1430_s8 + $0x128] sm:$0xff]  ;;  %s950_s19 = scalar_lea.sflag [#allocation8], %s1426_s5  ;;  %s1221_s23 = scalar_lea.vmem %s2413_s14, 128 }
  0x43   : > { %2652 = vst [vmem:[#allocation27_spill] sm:$0xff] %v1515_v49  ;;  %2657 = vst [vmem:[#allocation32_spill] sm:$0xff] %v1530_v54  ;;  %v1557_v63 = vadd.s32 %v353_v35, %v1447_v17  ;;  %v373_v2 = vsub.f32 %v1488_v40, %v1533_v55  ;;  %v374_v5 = vsub.f32 %v1491_v41, %v1554_v62  ;;  %v1600_v14 = vld [vmem:[%s1430_s8 + $0x130] sm:$0xff]  ;;  %v1617_v20 = vld [vmem:[%s1430_s8 + $0x58] sm:$0xff]  ;;  %p1222_p2 = scmp.ne.s32.totalorder %s2413_s14, %s1221_s23  ;;  %s1310_s25 = smov [#allocation9]  }
  0x44   : > { %2658 = vst [vmem:[#allocation33_spill] sm:$0xff] %v1533_v55  ;;  %2659 = vst [vmem:[#allocation34_spill] sm:$0xff] %v1536_v56  ;;  %v1574_v6 = vsub.f32 %v1488_v40, %v1497_v43  ;;  %v1578_v7 = vsub.f32 %v1491_v41, %v1500_v44  ;;  %v1582_v8 = vsub.f32 %v1506_v46, %v1503_v45  ;;  %v1620_v22 = vld [vmem:[%s1430_s8 + $0x60] sm:$0xff]  ;;  %v1623_v26 = vld [vmem:[%s1430_s8 + $0x68] sm:$0xff]  ;;  %s1225_s4 = sshll.u32 %s1310_s25, 4  ;;  %s1226_s4 = int_to_ptr.vmem [resolvable:$false] %s1225_s4 }
  0x45   : > { %2660 = vst [vmem:[#allocation35_spill] sm:$0xff] %v1539_v57  ;;  %2661 = vst [vmem:[#allocation36_spill] sm:$0xff] %v1542_v58  ;;  %v375_v15 = vsub.f32 %v1506_v46, %v1568_v4  ;;  %v1606_v16 = vsub.f32 %v1509_v47, %v1518_v50  ;;  %v1610_v18 = vsub.f32 %v1512_v48, %v1521_v51  ;;  %v1626_v30 = vld [vmem:[%s1430_s8 + $0x138] sm:$0xff]  ;;  %v1629_v31 = vld [vmem:[%s1430_s8 + $0x140] sm:$0xff]  ;;  %v381_v56 = vand.u32 2147483647, %v373_v2  ;;  %p1223_p3 = pnand %p1222_p2, %p1388_p9  ;;  %p1228_p5 = scmp.lt.s32.totalorder %s2413_s14, %s1226_s4 }
  0x46   : > { %2662 = vst [vmem:[#allocation37_spill] sm:$0xff] %v1545_v59  ;;  %2663 = vst [vmem:[#allocation38_spill] sm:$0xff] %v1548_v60  ;;  %v1614_v19 = vsub.f32 %v1527_v53, %v1524_v52  ;;  %v1632_v32 = vld [vmem:[%s1430_s8 + $0x148] sm:$0xff]  ;;  %v376_v35 = vsub.f32 %v1509_v47, %v1594_v12  ;;  %v377_v17 = vsub.f32 %v1512_v48, %v1597_v13  ;;  %v1646_v58 = vld [vmem:[%s1430_s8 + $0x70] sm:$0xff]  ;;  %v382_v49 = vand.u32 2147483647, %v374_v5 }
  0x47   : > { %2664 = vst [vmem:[#allocation39_spill] sm:$0xff] %v1554_v62  ;;  %2665 = vst [vmem:[#allocation40_spill] sm:$0xff] %v1557_v63  ;;  %v1640_v1 = vsub.f32 %v1548_v60, %v1545_v59  ;;  %v1643_v63 = vmul.f32 0.5, %v1551_v61  ;;  %v1649_v57 = vld [vmem:[%s1430_s8 + $0x78] sm:$0xff]  ;;  %v388_v42 = vsub.f32 %v1585_v9, %v1629_v31  ;;  %v389_v37 = vsub.f32 %v1588_v10, %v1632_v32  ;;  %v1680_v36 = vld [vmem:[%s1430_s8 + $0x180] sm:$0xff]  ;;  %p1224_p4 = pneg %p1223_p3  ;;  %s1227_s6 = scalar_lea.vmem %s1226_s4, 256 }
  0x48   : > { %2666 = vst [vmem:[#allocation41_spill] sm:$0xff] %v1565_v3  ;;  %2667 = vst [vmem:[#allocation42_spill] sm:$0xff] %v1568_v4  ;;  %v1668_v3 = vld [vmem:[%s1430_s8 + $0x170] sm:$0xff]  ;;  %v1677_v2 = vld [vmem:[%s1430_s8 + $0x178] sm:$0xff]  ;;  %v385_v55 = vand.u32 2147483647, %v377_v17  ;;  %p1229_p6 = scmp.lt.s32.totalorder %s1227_s6, %s1221_s23 }
  0x49   : > { %2668 = vst [vmem:[#allocation43_spill] sm:$0xff] %v1574_v6  ;;  %2669 = vst [vmem:[#allocation44_spill] sm:$0xff] %v1578_v7  ;;  %v1662_v7 = vld [vmem:[%s1430_s8 + $0x160] sm:$0xff]  ;;  %v1665_v6 = vld [vmem:[%s1430_s8 + $0x168] sm:$0xff] }
  0x4a   : > { %2670 = vst [vmem:[#allocation45_spill] sm:$0xff] %v1582_v8  ;;  %2671 = vst [vmem:[#allocation46_spill] sm:$0xff] %v1594_v12  ;;  %v380_v8 = vand.u32 2147483647, %v372_v0  ;;  %v1683_v33 = vld [vmem:[%s1430_s8 + $0x188] sm:$0xff]  ;;  %v1710_v4 = vld [vmem:[%s1430_s8 + $0x1b0] sm:$0xff]  ;;  %p1230_p7 = por %p1229_p6, %p1228_p5 }
  0x4b   : > { %2672 = vst [vmem:[#allocation47_spill] sm:$0xff] %v1597_v13  ;;  %2673 = vst [vmem:[#allocation48_spill] sm:$0xff] %v1600_v14  ;;  %v1698_v13 = vld [vmem:[%s1430_s8 + $0x1a0] sm:$0xff]  ;;  %v1707_v12 = vld [vmem:[%s1430_s8 + $0x1a8] sm:$0xff]  ;;  %v413_v54 = vsub.f32 %v1453_v23, %v1683_v33  ;;  %v397_v23 = vand.u32 2147483647, %v389_v37  ;;  %v418_v52 = vsub.f32 %v1468_v29, %v1710_v4 }
  0x4c   : > { %2674 = vst [vmem:[#allocation49_spill] sm:$0xff] %v1606_v16  ;;  %2675 = vst [vmem:[#allocation50_spill] sm:$0xff] %v1610_v18  ;;  %v1655_v18 = vld [vmem:[%s1430_s8 + $0x158] sm:$0xff]  ;;  %v378_v16 = vsub.f32 %v1527_v53, %v1600_v14  ;;  %v1731_v59 = vld [vmem:[%s1430_s8 + $0x1c0] sm:$0xff]  ;;  %p1231_p8 = pnand %p1230_p7, %p1224_p4 }
  0x4d   : > { %2676 = vst [vmem:[#allocation51_spill] sm:$0xff] %v1614_v19  ;;  %2677 = vst [vmem:[#allocation52_spill] sm:$0xff] %v1626_v30  ;;  %v1652_v19 = vld [vmem:[%s1430_s8 + $0x150] sm:$0xff]  ;;  %v391_v5 = vsub.f32 %v1617_v20, %v1655_v18  ;;  %v1695_v14 = vld [vmem:[%s1430_s8 + $0x198] sm:$0xff] }
  0x4e   : > { %2678 = vst [vmem:[#allocation53_spill] sm:$0xff] %v1629_v31  ;;  %2679 = vst [vmem:[#allocation54_spill] sm:$0xff] %v1632_v32  ;;  %v390_v0 = vsub.f32 %v1591_v11, %v1652_v19  ;;  %v392_v31 = vsub.f32 %v1620_v22, %v1662_v7  ;;  %v393_v32 = vsub.f32 %v1623_v26, %v1665_v6  ;;  %v1713_v62 = vld [vmem:[%s1430_s8 + $0x1b8] sm:$0xff]  ;;  %v1734_v17 = vld [vmem:[%s1430_s8 + $0x1c8] sm:$0xff] }
  0x4f   : > { %2680 = vst [vmem:[#allocation55_spill] sm:$0xff] %v1640_v1  ;;  %2681 = vst [vmem:[#allocation56_spill] sm:$0xff] %v1652_v19  ;;  %v379_v1 = vsub.f32 %v1548_v60, %v1626_v30  ;;  %v383_v30 = vand.u32 2147483647, %v375_v15  ;;  %v1692_v19 = vld [vmem:[%s1430_s8 + $0x190] sm:$0xff]  ;;  %v1746_v51 = vld [vmem:[%s1430_s8 + $0x1d8] sm:$0xff] }
  0x50   : > { %2682 = vst [vmem:[#allocation57_spill] sm:$0xff] %v1655_v18  ;;  %2683 = vst [vmem:[#allocation58_spill] sm:$0xff] %v1662_v7  ;;  %v384_v15 = vand.u32 2147483647, %v376_v35  ;;  %v394_v18 = vsub.f32 %v1646_v58, %v1668_v3  ;;  %v395_v7 = vsub.f32 %v1649_v57, %v1677_v2  ;;  %v414_v35 = vsub.f32 %v1456_v24, %v1692_v19  ;;  %v1743_v53 = vld [vmem:[%s1430_s8 + $0x1d0] sm:$0xff] }
  0x51   : > { %2684 = vst [vmem:[#allocation59_spill] sm:$0xff] %v1665_v6  ;;  %2685 = vst [vmem:[#allocation60_spill] sm:$0xff] %v1668_v3  ;;  %v412_v6 = vsub.f32 %v1450_v21, %v1680_v36  ;;  %v1722_v3 = vld [vmem:[%s1430_s8 + $0xc8] sm:$0xff]  ;;  %v1725_v21 = vld [vmem:[%s1430_s8 + $0xd0] sm:$0xff]  ;;  %v396_v60 = vand.u32 2147483647, %v388_v42  ;;  %v417_v24 = vsub.f32 %v1465_v28, %v1707_v12  ;;  %v436_v28 = vsub.f32 %v1551_v61, %v1731_v59 }
  0x52   : > { %2686 = vst [vmem:[#allocation61_spill] sm:$0xff] %v1677_v2  ;;  %2687 = vst [vmem:[#allocation62_spill] sm:$0xff] %v1680_v36  ;;  %v415_v2 = vsub.f32 %v1459_v25, %v1695_v14  ;;  %v1728_v36 = vld [vmem:[%s1430_s8 + $0xd8] sm:$0xff]  ;;  %v386_v25 = vand.u32 2147483647, %v378_v16  ;;  %v438_v29 = vsub.f32 %v1725_v21, %v1743_v53  ;;  %v1764_v61 = vld [vmem:[%s1430_s8 + $0x1e8] sm:$0xff] }
  0x53   : > { %2688 = vst [vmem:[#allocation63_spill] sm:$0xff] %v1683_v33  ;;  %2689 = vst [vmem:[#allocation64_spill] sm:$0xff] %v1692_v19  ;;  %v416_v33 = vsub.f32 %v1462_v27, %v1698_v13  ;;  %v399_v19 = vand.u32 2147483647, %v391_v5  ;;  %v387_v37 = vand.u32 2147483647, %v379_v1  ;;  %v419_v27 = vsub.f32 %v1473_v34, %v1713_v62 }
  0x54   : > { %2690 = vst [vmem:[#allocation65_spill] sm:$0xff] %v1695_v14  ;;  %2691 = vst [vmem:[#allocation66_spill] sm:$0xff] %v1698_v13  ;;  %v398_v14 = vand.u32 2147483647, %v390_v0  ;;  %v400_v42 = vand.u32 2147483647, %v392_v31  ;;  %v437_v0 = vsub.f32 %v1722_v3, %v1734_v17  ;;  %v439_v5 = vsub.f32 %v1728_v36, %v1746_v51 }
  0x55   : > { %2692 = vst [vmem:[#allocation67_spill] sm:$0xff] %v1707_v12  ;;  %2693 = vst [vmem:[#allocation68_spill] sm:$0xff] %v1710_v4  ;;  %v401_v16 = vand.u32 2147483647, %v393_v32  ;;  %v1074_v4 = vld [vmem:[%s1430_s8 + $0xe0] sm:$0xff]  ;;  %v1075_v1 = vld [vmem:[%s1430_s8 + $0xe8] sm:$0xff]  ;;  %v404_v34 = vadd.f32 %v396_v60, %v380_v8 }
  0x56   : > { %2694 = vst [vmem:[#allocation69_spill] sm:$0xff] %v1713_v62  ;;  %2695 = vst [vmem:[#allocation70_spill] sm:$0xff] %v1731_v59  ;;  %v402_v31 = vand.u32 2147483647, %v394_v18  ;;  %v403_v12 = vand.u32 2147483647, %v395_v7  ;;  %v405_v62 = vadd.f32 %v397_v23, %v381_v56  ;;  %v406_v32 = vadd.f32 %v398_v14, %v382_v49 }
  0x57   : > { %2696 = vst [vmem:[#allocation71_spill] sm:$0xff] %v1734_v17  ;;  %2697 = vst [vmem:[#allocation72_spill] sm:$0xff] %v1743_v53  ;;  %v1761_v13 = vld [vmem:[%s1430_s8 + $0x1e0] sm:$0xff]  ;;  %v407_v17 = vadd.f32 %v399_v19, %v383_v30  ;;  %v420_v53 = vand.u32 2147483647, %v412_v6  ;;  %v408_v48 = vadd.f32 %v400_v42, %v384_v15  ;;  %v1076_v45 = vld [vmem:[%s1430_s8 + $0xf0] sm:$0xff]  ;;  %v409_v7 = vadd.f32 %v401_v16, %v385_v55 }
  0x58   : > { %2698 = vst [vmem:[#allocation73_spill] sm:$0xff] %v1746_v51  ;;  %2699 = vst [vmem:[#allocation74_spill] sm:$0xff] %v1761_v13  ;;  %v421_v59 = vand.u32 2147483647, %v413_v54  ;;  %v422_v51 = vand.u32 2147483647, %v414_v35  ;;  %v440_v56 = vsub.f32 %v1074_v4, %v1761_v13  ;;  %v441_v8 = vsub.f32 %v1075_v1, %v1764_v61 }
  0x59   : > { %2700 = vst [vmem:[#allocation75_spill] sm:$0xff] %v1764_v61  ;;  %v423_v50 = vand.u32 2147483647, %v415_v2  ;;  %v424_v47 = vand.u32 2147483647, %v416_v33  ;;  %v1768_v46 = vld [vmem:[%s1430_s8 + $0x1f0] sm:$0xff]  ;;  %v410_v49 = vadd.f32 %v402_v31, %v386_v25  ;;  %v411_v14 = vadd.f32 %v403_v12, %v387_v37 }
  0x5a   : > { %v425_v60 = vand.u32 2147483647, %v417_v24  ;;  %v1077_v18 = vld [vmem:[%s1430_s8 + $0xf8] sm:$0xff]  ;;  %v426_v6 = vand.u32 2147483647, %v418_v52  ;;  %v442_v54 = vsub.f32 %v1076_v45, %v1768_v46  ;;  %v428_v30 = vadd.f32 %v420_v53, %v404_v34 }
  0x5b   : > { %v1774_v23 = vld [vmem:[%s1430_s8 + $0x1f8] sm:$0xff]  ;;  %v427_v19 = vand.u32 2147483647, %v419_v27  ;;  %v429_v33 = vadd.f32 %v421_v59, %v405_v62  ;;  %v430_v15 = vadd.f32 %v422_v51, %v406_v32  ;;  %v431_v55 = vadd.f32 %v423_v50, %v407_v17 }
  0x5c   : > { %v443_v2 = vsub.f32 %v1077_v18, %v1774_v23  ;;  %v432_v35 = vadd.f32 %v424_v47, %v408_v48  ;;  %v444_v24 = vand.u32 2147483647, %v436_v28  ;;  %v433_v42 = vadd.f32 %v425_v60, %v409_v7  ;;  %v2719_v32 = vld [vmem:[#allocation20_spill] sm:$0xff]  ;;  %v2720_v7 = vld [vmem:[#allocation22_spill] sm:$0xff] }
  0x5d   : > { %v445_v16 = vand.u32 2147483647, %v437_v0  ;;  %v446_v61 = vand.u32 2147483647, %v438_v29  ;;  %v447_v13 = vand.u32 2147483647, %v439_v5  ;;  %v434_v44 = vadd.f32 %v426_v6, %v410_v49 }
  0x5e   : > { %v448_v41 = vand.u32 2147483647, %v440_v56  ;;  %v449_v25 = vand.u32 2147483647, %v441_v8  ;;  %v450_v12 = vand.u32 2147483647, %v442_v54  ;;  %v435_v52 = vadd.f32 %v427_v19, %v411_v14 }
  0x5f   : > { %v451_v37 = vand.u32 2147483647, %v443_v2  ;;  %v477_v27 = vmul.f32 0.5, %v1722_v3  ;;  %v478_v53 = vmul.f32 0.5, %v1725_v21  ;;  %v479_v59 = vmul.f32 0.5, %v1728_v36  ;;  %v2722_v56 = vld [vmem:[#allocation24_spill] sm:$0xff] }
  0x60   : > { %v480_v51 = vmul.f32 0.5, %v1074_v4  ;;  %v481_v50 = vmul.f32 0.5, %v1075_v1  ;;  %v482_v47 = vmul.f32 0.5, %v1076_v45  ;;  %v1781_v48 = vadd.f32 %v444_v24, %v428_v30  ;;  %v2723_v8 = vld [vmem:[#allocation23_spill] sm:$0xff]  ;;  %v2725_v49 = vld [vmem:[#allocation25_spill] sm:$0xff]  ;;  %v2726_v14 = vld [vmem:[#allocation28_spill] sm:$0xff] }
  0x61   : > { %v1783_v62 = vadd.f32 %v445_v16, %v429_v33  ;;  %v1785_v17 = vadd.f32 %v446_v61, %v430_v15  ;;  %v483_v28 = vmul.f32 0.5, %v1077_v18  ;;  %v1787_v0 = vadd.f32 %v447_v13, %v431_v55  ;;  %v2728_v54 = vld [vmem:[#allocation26_spill] sm:$0xff]  ;;  %v2729_v19 = vld [vmem:[#allocation29_spill] sm:$0xff] }
  0x62   : > { %2701 = vst [vmem:[#allocation76_spill] sm:$0xff] %v1781_v48  ;;  %v1789_v29 = vadd.f32 %v448_v41, %v432_v35  ;;  %v1791_v5 = vadd.f32 %v449_v25, %v433_v42  ;;  %v1793_v3 = vadd.f32 %v450_v12, %v434_v44  ;;  %v1795_v21 = vadd.f32 %v451_v37, %v435_v52  ;;  %v2732_v30 = vld [vmem:[#allocation30_spill] sm:$0xff]  ;;  %v2735_v33 = vld [vmem:[#allocation37_spill] sm:$0xff]  ;;  %v2746_v12 = vld [vmem:[#allocation63_spill] sm:$0xff] }
  0x63   : > { %2702 = vst [vmem:[#allocation77_spill] sm:$0xff] %v1783_v62  ;;  %2703 = vst [vmem:[#allocation78_spill] sm:$0xff] %v1785_v17  ;;  %v1799_v36 = vsub.f32 %v1585_v9, %v1643_v63  ;;  %v1802_v45 = vsub.f32 %v1588_v10, %v477_v27  ;;  %v1805_v4 = vsub.f32 %v1591_v11, %v478_v53  ;;  %v2747_v52 = vld [vmem:[#allocation64_spill] sm:$0xff]  ;;  %v2781_v62 = vld [vmem:[#allocation57_spill] sm:$0xff] }
  0x64   : > { %2704 = vst [vmem:[#allocation79_spill] sm:$0xff] %v1787_v0  ;;  %2705 = vst [vmem:[#allocation80_spill] sm:$0xff] %v1789_v29  ;;  %v1808_v13 = vsub.f32 %v1617_v20, %v479_v59  ;;  %v1811_v41 = vsub.f32 %v1620_v22, %v480_v51  ;;  %v1814_v44 = vsub.f32 %v1623_v26, %v481_v50  ;;  %v510_v37 = vmul.f32 0.5, %v2747_v52  ;;  %v2777_v29 = vld [vmem:[#allocation54_spill] sm:$0xff]  ;;  %v2779_v0 = vld [vmem:[#allocation56_spill] sm:$0xff] }
  0x65   : > { %2706 = vst [vmem:[#allocation81_spill] sm:$0xff] %v1791_v5  ;;  %2707 = vst [vmem:[#allocation82_spill] sm:$0xff] %v1793_v3  ;;  %v1817_v1 = vsub.f32 %v1646_v58, %v482_v47  ;;  %v1820_v31 = vsub.f32 %v1649_v57, %v483_v28  ;;  %v1824_v34 = vadd.f32 %v1482_v38, %v1485_v39  ;;  %v2731_v39 = vld [vmem:[#allocation31_spill] sm:$0xff]  ;;  %v2775_v3 = vld [vmem:[#allocation53_spill] sm:$0xff] }
  0x66   : > { %2708 = vst [vmem:[#allocation83_spill] sm:$0xff] %v1795_v21  ;;  %2709 = vst [vmem:[#allocation84_spill] sm:$0xff] %v1799_v36  ;;  %v1828_v61 = vadd.f32 %v1497_v43, %v1488_v40  ;;  %v1832_v60 = vadd.f32 %v2720_v7, %v2719_v32  ;;  %v1836_v18 = vadd.f32 %v2723_v8, %v2722_v56  ;;  %v2734_v43 = vld [vmem:[#allocation38_spill] sm:$0xff]  ;;  %v2752_v32 = vld [vmem:[#allocation69_spill] sm:$0xff] }
  0x67   : > { %2710 = vst [vmem:[#allocation85_spill] sm:$0xff] %v1802_v45  ;;  %2711 = vst [vmem:[#allocation86_spill] sm:$0xff] %v1805_v4  ;;  %v1840_v6 = vadd.f32 %v2726_v14, %v2725_v49  ;;  %v1844_v38 = vadd.f32 %v2729_v19, %v2728_v54  ;;  %v1848_v40 = vadd.f32 %v2732_v30, %v2731_v39  ;;  %v2755_v56 = vld [vmem:[#allocation72_spill] sm:$0xff]  ;;  %v2756_v49 = vld [vmem:[#allocation73_spill] sm:$0xff] }
  0x68   : > { %2712 = vst [vmem:[#allocation87_spill] sm:$0xff] %v1808_v13  ;;  %2713 = vst [vmem:[#allocation88_spill] sm:$0xff] %v1811_v41  ;;  %v1852_v2 = vadd.f32 %v2735_v33, %v2734_v43  ;;  %v1856_v15 = vadd.f32 %v1585_v9, %v1643_v63  ;;  %v1859_v55 = vadd.f32 %v1588_v10, %v477_v27  ;;  %v2745_v9 = vld [vmem:[#allocation62_spill] sm:$0xff]  ;;  %v526_v8 = vmul.f32 0.5, %v2755_v56  ;;  %v2758_v39 = vld [vmem:[#allocation75_spill] sm:$0xff] }
  0x69   : > { %2714 = vst [vmem:[#allocation89_spill] sm:$0xff] %v1814_v44  ;;  %2715 = vst [vmem:[#allocation90_spill] sm:$0xff] %v1817_v1  ;;  %v1862_v35 = vadd.f32 %v1591_v11, %v478_v53  ;;  %v1865_v24 = vadd.f32 %v1617_v20, %v479_v59  ;;  %v1868_v42 = vadd.f32 %v1620_v22, %v480_v51  ;;  %v508_v10 = vmul.f32 0.5, %v2745_v9  ;;  %v2748_v20 = vld [vmem:[#allocation65_spill] sm:$0xff]  ;;  %v2749_v53 = vld [vmem:[#allocation66_spill] sm:$0xff] }
  0x6a   : > { %2716 = vst [vmem:[#allocation91_spill] sm:$0xff] %v1820_v31  ;;  %2717 = vst [vmem:[#allocation92_spill] sm:$0xff] %v1824_v34  ;;  %v1871_v16 = vadd.f32 %v1623_v26, %v481_v50  ;;  %v1874_v25 = vadd.f32 %v1646_v58, %v482_v47  ;;  %v1877_v63 = vadd.f32 %v1649_v57, %v483_v28  ;;  %v509_v11 = vmul.f32 0.5, %v2746_v12  ;;  %v2750_v59 = vld [vmem:[#allocation67_spill] sm:$0xff]  ;;  %v2751_v26 = vld [vmem:[#allocation68_spill] sm:$0xff] }
  0x6b   : > { %2718 = vst [vmem:[#allocation93_spill] sm:$0xff] %v1828_v61  ;;  %2721 = vst [vmem:[#allocation20_spill] sm:$0xff] %v1832_v60  ;;  %v511_v27 = vmul.f32 0.5, %v2748_v20  ;;  %v512_v22 = vmul.f32 0.5, %v2749_v53  ;;  %v513_v51 = vmul.f32 0.5, %v2750_v59  ;;  %v514_v50 = vmul.f32 0.5, %v2751_v26 }
  0x6c   : > { %2724 = vst [vmem:[#allocation22_spill] sm:$0xff] %v1836_v18  ;;  %2727 = vst [vmem:[#allocation24_spill] sm:$0xff] %v1840_v6  ;;  %v515_v58 = vmul.f32 0.5, %v2752_v32  ;;  %v2753_v47 = vld [vmem:[#allocation70_spill] sm:$0xff]  ;;  %v2754_v57 = vld [vmem:[#allocation71_spill] sm:$0xff]  ;;  %v527_v14 = vmul.f32 0.5, %v2756_v49  ;;  %v1926_v17 = vsub.f32 %v2779_v0, %v526_v8 }
  0x6d   : > { %2730 = vst [vmem:[#allocation23_spill] sm:$0xff] %v1844_v38  ;;  %2733 = vst [vmem:[#allocation25_spill] sm:$0xff] %v1848_v40  ;;  %v524_v7 = vmul.f32 0.5, %v2753_v47  ;;  %v525_v28 = vmul.f32 0.5, %v2754_v57  ;;  %v2757_v54 = vld [vmem:[#allocation74_spill] sm:$0xff]  ;;  %v529_v30 = vmul.f32 0.5, %v2758_v39 }
  0x6e   : > { %2736 = vst [vmem:[#allocation28_spill] sm:$0xff] %v1852_v2  ;;  %2737 = vst [vmem:[#allocation26_spill] sm:$0xff] %v1856_v15  ;;  %v528_v19 = vmul.f32 0.5, %v2757_v54  ;;  %v530_v43 = vmul.f32 0.5, %v1768_v46  ;;  %v2759_v33 = vld [vmem:[#allocation32_spill] sm:$0xff]  ;;  %v2761_v12 = vld [vmem:[#allocation33_spill] sm:$0xff]  ;;  %v1929_v48 = vsub.f32 %v2781_v62, %v527_v14 }
  0x6f   : > { %2738 = vst [vmem:[#allocation29_spill] sm:$0xff] %v1859_v55  ;;  %2739 = vst [vmem:[#allocation31_spill] sm:$0xff] %v1862_v35  ;;  %v1895_v9 = vsub.f32 %v2759_v33, %v508_v10  ;;  %v1898_v52 = vsub.f32 %v2761_v12, %v509_v11  ;;  %v2763_v20 = vld [vmem:[#allocation39_spill] sm:$0xff]  ;;  %v531_v59 = vmul.f32 0.5, %v1774_v23  ;;  %v2765_v26 = vld [vmem:[#allocation42_spill] sm:$0xff]  ;;  %v1920_v5 = vsub.f32 %v2775_v3, %v524_v7 }
  0x70   : > { %2740 = vst [vmem:[#allocation30_spill] sm:$0xff] %v1865_v24  ;;  %2741 = vst [vmem:[#allocation38_spill] sm:$0xff] %v1868_v42  ;;  %v1901_v53 = vsub.f32 %v2763_v20, %v510_v37  ;;  %v1905_v32 = vsub.f32 %v2765_v26, %v511_v27  ;;  %v2767_v47 = vld [vmem:[#allocation46_spill] sm:$0xff]  ;;  %v2769_v56 = vld [vmem:[#allocation47_spill] sm:$0xff]  ;;  %v1923_v23 = vsub.f32 %v2777_v29, %v525_v28 }
  0x71   : > { %2742 = vst [vmem:[#allocation37_spill] sm:$0xff] %v1871_v16  ;;  %2743 = vst [vmem:[#allocation94_spill] sm:$0xff] %v1874_v25  ;;  %v1908_v57 = vsub.f32 %v2767_v47, %v512_v22  ;;  %v1911_v49 = vsub.f32 %v2769_v56, %v513_v51  ;;  %v2771_v46 = vld [vmem:[#allocation48_spill] sm:$0xff] }
  0x72   : > { %2744 = vst [vmem:[#allocation95_spill] sm:$0xff] %v1877_v63  ;;  %2760 = vst [vmem:[#allocation62_spill] sm:$0xff] %v1895_v9  ;;  %v1914_v54 = vsub.f32 %v2771_v46, %v514_v50  ;;  %v2773_v39 = vld [vmem:[#allocation52_spill] sm:$0xff]  ;;  %v2792_v9 = vld [vmem:[#allocation61_spill] sm:$0xff] }
  0x73   : > { %2762 = vst [vmem:[#allocation63_spill] sm:$0xff] %v1898_v52  ;;  %2764 = vst [vmem:[#allocation64_spill] sm:$0xff] %v1901_v53  ;;  %v1917_v21 = vsub.f32 %v2773_v39, %v515_v58  ;;  %v2787_v53 = vld [vmem:[#allocation60_spill] sm:$0xff]  ;;  %v2789_v52 = vld [vmem:[#allocation17_spill] sm:$0xff] }
  0x74   : > { %2766 = vst [vmem:[#allocation65_spill] sm:$0xff] %v1905_v32  ;;  %2768 = vst [vmem:[#allocation66_spill] sm:$0xff] %v1908_v57  ;;  %v2783_v57 = vld [vmem:[#allocation58_spill] sm:$0xff]  ;;  %v2785_v32 = vld [vmem:[#allocation59_spill] sm:$0xff] }
  0x75   : > { %2770 = vst [vmem:[#allocation67_spill] sm:$0xff] %v1911_v49  ;;  %2772 = vst [vmem:[#allocation68_spill] sm:$0xff] %v1914_v54  ;;  %v1932_v49 = vsub.f32 %v2783_v57, %v528_v19  ;;  %v1935_v54 = vsub.f32 %v2785_v32, %v529_v30 }
  0x76   : > { %2774 = vst [vmem:[#allocation69_spill] sm:$0xff] %v1917_v21  ;;  %2776 = vst [vmem:[#allocation70_spill] sm:$0xff] %v1920_v5  ;;  %v1938_v21 = vsub.f32 %v2787_v53, %v530_v43  ;;  %v2790_v5 = vld [vmem:[#allocation18_spill] sm:$0xff] }
  0x77   : > { %2778 = vst [vmem:[#allocation71_spill] sm:$0xff] %v1923_v23  ;;  %2780 = vst [vmem:[#allocation72_spill] sm:$0xff] %v1926_v17  ;;  %vm364_vm0 = vcmp.lt.s32.totalorder %v2790_v5, %v2789_v52  ;;  %v2791_v23 = vld [vmem:[#allocation19_spill] sm:$0xff]  ;;  %v1945_v17 = vsub.f32 %v2792_v9, %v531_v59  ;;  %v1959_v5 = vadd.f32 %v2765_v26, %v511_v27 }
  0x78   : > { %2782 = vst [vmem:[#allocation73_spill] sm:$0xff] %v1929_v48  ;;  %2784 = vst [vmem:[#allocation74_spill] sm:$0xff] %v1932_v49  ;;  %vm365_vm1 = vcmp.lt.s32.totalorder %v2791_v23, %v2789_v52  ;;  %v1948_v48 = vadd.f32 %v2759_v33, %v508_v10  ;;  %v1951_v49 = vadd.f32 %v2761_v12, %v509_v11 }
  0x79   : > { %2786 = vst [vmem:[#allocation75_spill] sm:$0xff] %v1935_v54  ;;  %2788 = vst [vmem:[#allocation32_spill] sm:$0xff] %v1938_v21  ;;  %v1954_v54 = vadd.f32 %v2763_v20, %v510_v37  ;;  %v2797_v21 = vld [vmem:[#allocation21_spill] sm:$0xff]  ;;  %v1962_v23 = vadd.f32 %v2767_v47, %v512_v22  ;;  %v1968_v10 = vadd.f32 %v2771_v46, %v514_v50  ;;  %v2806_v22 = vld [vmem:[#allocation27_spill] sm:$0xff] }
  0x7a   : > { %2793 = vst [vmem:[#allocation33_spill] sm:$0xff] %v1945_v17  ;;  %2794 = vst [vmem:[#allocation39_spill] sm:$0xff] %v1948_v48  ;;  %vm366_vm2 = vcmp.lt.s32.totalorder %v2797_v21, %v2789_v52  ;;  %v1965_v17 = vadd.f32 %v2769_v56, %v513_v51  ;;  %v1971_v11 = vadd.f32 %v2773_v39, %v515_v58  ;;  %v2821_v47 = vld [vmem:[#allocation36_spill] sm:$0xff]  ;;  %v2823_v56 = vld [vmem:[#allocation55_spill] sm:$0xff] }
  0x7b   : > { %2795 = vst [vmem:[#allocation42_spill] sm:$0xff] %v1951_v49  ;;  %2796 = vst [vmem:[#allocation46_spill] sm:$0xff] %v1954_v54  ;;  %v1974_v37 = vadd.f32 %v2775_v3, %v524_v7  ;;  %v1977_v33 = vadd.f32 %v2777_v29, %v525_v28  ;;  %v1980_v27 = vadd.f32 %v2779_v0, %v526_v8  ;;  %v2812_v0 = vld [vmem:[#allocation41_spill] sm:$0xff]  ;;  %v2813_v28 = vld [vmem:[#allocation43_spill] sm:$0xff] }
  0x7c   : > { %2798 = vst [vmem:[#allocation47_spill] sm:$0xff] %v1959_v5  ;;  %2799 = vst [vmem:[#allocation48_spill] sm:$0xff] %v1962_v23  ;;  %vm367_vm3 = vcmp.lt.s32.totalorder %v2806_v22, %v2789_v52  ;;  %v1985_v51 = vadd.f32 %v2781_v62, %v527_v14  ;;  %v1988_v50 = vadd.f32 %v2783_v57, %v528_v19  ;;  %v2814_v62 = vld [vmem:[#allocation44_spill] sm:$0xff]  ;;  %v2815_v19 = vld [vmem:[#allocation34_spill] sm:$0xff] }
  0x7d   : > { %2800 = vst [vmem:[#allocation52_spill] sm:$0xff] %v1965_v17  ;;  %2801 = vst [vmem:[#allocation53_spill] sm:$0xff] %v1968_v10  ;;  %v1991_v58 = vadd.f32 %v2785_v32, %v529_v30  ;;  %v1994_v3 = vadd.f32 %v2787_v53, %v530_v43  ;;  %v1997_v29 = vadd.f32 %v2792_v9, %v531_v59  ;;  %v2816_v30 = vld [vmem:[#allocation45_spill] sm:$0xff]  ;;  %v2818_v9 = vld [vmem:[#allocation50_spill] sm:$0xff] }
  0x7e   : > { %2802 = vst [vmem:[#allocation54_spill] sm:$0xff] %v1971_v11  ;;  %2803 = vst [vmem:[#allocation56_spill] sm:$0xff] %v1974_v37  ;;  %v556_v7 = vsub.f32 %v1824_v34, %v2812_v0  ;;  %v557_v8 = vsub.f32 %v1828_v61, %v2813_v28  ;;  %v558_v14 = vsub.f32 %v1832_v60, %v2814_v62  ;;  %v2817_v43 = vld [vmem:[#allocation49_spill] sm:$0xff]  ;;  %v2819_v59 = vld [vmem:[#allocation51_spill] sm:$0xff] }
  0x7f   : > { %2804 = vst [vmem:[#allocation57_spill] sm:$0xff] %v1977_v33  ;;  %2805 = vst [vmem:[#allocation58_spill] sm:$0xff] %v1980_v27  ;;  %vm368_vm4 = vcmp.lt.s32.totalorder %v2815_v19, %v2789_v52  ;;  %v559_v12 = vsub.f32 %v1836_v18, %v2816_v30  ;;  %v560_v20 = vsub.f32 %v1840_v6, %v2817_v43  ;;  %v2820_v32 = vld [vmem:[#allocation35_spill] sm:$0xff]  ;;  %v2822_v57 = vld [vmem:[#allocation40_spill] sm:$0xff] }
  0x80   : > { %2807 = vst [vmem:[#allocation59_spill] sm:$0xff] %v1985_v51  ;;  %2808 = vst [vmem:[#allocation60_spill] sm:$0xff] %v1988_v50  ;;  %v561_v53 = vsub.f32 %v1844_v38, %v2818_v9  ;;  %v562_v26 = vsub.f32 %v1848_v40, %v2819_v59  ;;  %vm369_vm5 = vcmp.lt.s32.totalorder %v2820_v32, %v2789_v52  ;;  %v2824_v40 = vld [vmem:[#allocation62_spill] sm:$0xff]  ;;  %v2825_v6 = vld [vmem:[#allocation63_spill] sm:$0xff] }
  0x81   : > { %2809 = vst [vmem:[#allocation61_spill] sm:$0xff] %v1991_v58  ;;  %2810 = vst [vmem:[#allocation96_spill] sm:$0xff] %v1994_v3  ;;  %vm370_vm6 = vcmp.lt.s32.totalorder %v2821_v47, %v2789_v52  ;;  %vm371_vm7 = vcmp.lt.s32.totalorder %v2822_v57, %v2789_v52  ;;  %v563_v46 = vsub.f32 %v1852_v2, %v2823_v56  ;;  %v2826_v28 = vld [vmem:[#allocation64_spill] sm:$0xff]  ;;  %v2827_v60 = vld [vmem:[#allocation65_spill] sm:$0xff] }
  0x82   : > { %2811 = vst [vmem:[#allocation97_spill] sm:$0xff] %v1997_v29  ;;  %v564_v39 = vsub.f32 %v1856_v15, %v1799_v36  ;;  %v565_v9 = vsub.f32 %v1859_v55, %v1802_v45  ;;  %v566_v59 = vsub.f32 %v1862_v35, %v1805_v4  ;;  %v567_v43 = vsub.f32 %v1865_v24, %v1808_v13  ;;  %v2828_v61 = vld [vmem:[#allocation66_spill] sm:$0xff]  ;;  %v2829_v34 = vld [vmem:[#allocation67_spill] sm:$0xff]  ;;  %v2830_v57 = vld [vmem:[#allocation68_spill] sm:$0xff] }
  0x83   : > { %v568_v30 = vsub.f32 %v1868_v42, %v1811_v41  ;;  %v569_v62 = vsub.f32 %v1871_v16, %v1814_v44  ;;  %v570_v56 = vsub.f32 %v1874_v25, %v1817_v1  ;;  %v571_v2 = vsub.f32 %v1877_v63, %v1820_v31  ;;  %v2831_v47 = vld [vmem:[#allocation69_spill] sm:$0xff]  ;;  %v2841_v19 = vld [vmem:[#allocation75_spill] sm:$0xff]  ;;  %v2842_v4 = vld [vmem:[#allocation32_spill] sm:$0xff] }
  0x84   : > { %v580_v38 = vsub.f32 %v1948_v48, %v2824_v40  ;;  %v581_v18 = vsub.f32 %v1951_v49, %v2825_v6  ;;  %v582_v0 = vsub.f32 %v1954_v54, %v2826_v28  ;;  %v583_v41 = vsub.f32 %v1959_v5, %v2827_v60  ;;  %v2832_v48 = vld [vmem:[#allocation70_spill] sm:$0xff]  ;;  %v2833_v49 = vld [vmem:[#allocation71_spill] sm:$0xff]  ;;  %v2834_v54 = vld [vmem:[#allocation72_spill] sm:$0xff] }
  0x85   : > { %v584_v44 = vsub.f32 %v1962_v23, %v2828_v61  ;;  %v585_v1 = vsub.f32 %v1965_v17, %v2829_v34  ;;  %v586_v31 = vsub.f32 %v1968_v10, %v2830_v57  ;;  %v587_v40 = vsub.f32 %v1971_v11, %v2831_v47  ;;  %v2835_v5 = vld [vmem:[#allocation73_spill] sm:$0xff]  ;;  %v2836_v23 = vld [vmem:[#allocation74_spill] sm:$0xff]  ;;  %v2837_v17 = vld [vmem:[#allocation76_spill] sm:$0xff] }
  0x86   : > { %v588_v6 = vsub.f32 %v1974_v37, %v2832_v48  ;;  %v589_v28 = vsub.f32 %v1977_v33, %v2833_v49  ;;  %v590_v60 = vsub.f32 %v1980_v27, %v2834_v54  ;;  %v591_v61 = vsub.f32 %v1985_v51, %v2835_v5  ;;  %v2839_v11 = vld [vmem:[#allocation77_spill] sm:$0xff]  ;;  %v2847_v42 = vld [vmem:[#allocation72_spill] sm:$0xff]  ;;  %v2857_v63 = vld [vmem:[#allocation83_spill] sm:$0xff] }
  0x87   : > { %v592_v34 = vsub.f32 %v1988_v50, %v2836_v23  ;;  %v820_v47 = vsel %vm364_vm0, %v2837_v17, 0.0  ;;  %v821_v32 = vsel %vm365_vm1, %v2839_v11, 0.0  ;;  %v593_v13 = vsub.f32 %v1991_v58, %v2841_v19  ;;  %v2843_v5 = vld [vmem:[#allocation33_spill] sm:$0xff]  ;;  %v2844_v23 = vld [vmem:[#allocation78_spill] sm:$0xff]  ;;  %v2884_v52 = vld [vmem:[#allocation44_spill] sm:$0xff] }
  0x88   : > { %v594_v54 = vsub.f32 %v1994_v3, %v2842_v4  ;;  %v595_v45 = vsub.f32 %v1997_v29, %v2843_v5  ;;  %v822_v57 = vsel %vm366_vm2, %v2844_v23, 0.0  ;;  %v896_v19 = vadd.f32 %v821_v32, %v820_v47  ;;  %v2845_v23 = vld [vmem:[#allocation79_spill] sm:$0xff]  ;;  %v2846_v5 = vld [vmem:[#allocation85_spill] sm:$0xff] }
  0x89   : > { %v823_v17 = vsel %vm367_vm3, %v2845_v23, 0.0  ;;  %v2851_v23 = vld [vmem:[#allocation80_spill] sm:$0xff]  ;;  %v2853_v25 = vld [vmem:[#allocation81_spill] sm:$0xff]  ;;  %v827_v22 = vsel %vm371_vm7, %v2857_v63, 0.0  ;;  %v2127_v50 = vmul.f32 %v564_v39, %v556_v7  ;;  %v2129_v24 = vmul.f32 %v565_v9, %v557_v8 }
  0x8a   : > { %v897_v4 = vadd.f32 %v896_v19, %v822_v57  ;;  %v824_v11 = vsel %vm368_vm4, %v2851_v23, 0.0  ;;  %v825_v47 = vsel %vm369_vm5, %v2853_v25, 0.0  ;;  %v2855_v19 = vld [vmem:[#allocation82_spill] sm:$0xff]  ;;  %v2131_v23 = vmul.f32 %v566_v59, %v558_v14  ;;  %v2876_v9 = vld [vmem:[#allocation24_spill] sm:$0xff] }
  0x8b   : > { %v826_v10 = vsel %vm370_vm6, %v2855_v19, 0.0  ;;  %v2133_v58 = vmul.f32 %v567_v43, %v559_v12  ;;  %v2135_v32 = vmul.f32 %v568_v30, %v560_v20  ;;  %v2137_v21 = vmul.f32 %v569_v62, %v561_v53  ;;  %v2863_v12 = vld [vmem:[#allocation39_spill] sm:$0xff]  ;;  %v2877_v59 = vld [vmem:[#allocation52_spill] sm:$0xff] }
  0x8c   : > { %v898_v29 = vadd.f32 %v897_v4, %v823_v17  ;;  %v2139_v19 = vmul.f32 %v570_v56, %v562_v26  ;;  %v2141_v57 = vmul.f32 %v571_v2, %v563_v46  ;;  %v2143_v16 = vmul.f32 %v588_v6, %v580_v38  ;;  %v2864_v2 = vld [vmem:[#allocation92_spill] sm:$0xff]  ;;  %v2865_v6 = vld [vmem:[#allocation42_spill] sm:$0xff]  ;;  %v2866_v38 = vld [vmem:[#allocation93_spill] sm:$0xff] }
  0x8d   : > { %v2145_v4 = vmul.f32 %v589_v28, %v581_v18  ;;  %v2147_v63 = vmul.f32 %v590_v60, %v582_v0  ;;  %v2149_v8 = vmul.f32 %v591_v61, %v583_v41  ;;  %v2151_v14 = vmul.f32 %v592_v34, %v584_v44  ;;  %v2867_v60 = vld [vmem:[#allocation46_spill] sm:$0xff]  ;;  %v2868_v0 = vld [vmem:[#allocation20_spill] sm:$0xff]  ;;  %v2870_v61 = vld [vmem:[#allocation41_spill] sm:$0xff] }
  0x8e   : > { %v899_v25 = vadd.f32 %v898_v29, %v824_v11  ;;  %2859 = vst [vmem:[#allocation76_spill] sm:$0xff] %v2139_v19  ;;  %2860 = vst [vmem:[#allocation77_spill] sm:$0xff] %v2141_v57  ;;  %v2153_v29 = vmul.f32 %v593_v13, %v585_v1  ;;  %v2155_v30 = vmul.f32 %v594_v54, %v586_v31  ;;  %v2869_v41 = vld [vmem:[#allocation62_spill] sm:$0xff]  ;;  %v2871_v34 = vld [vmem:[#allocation63_spill] sm:$0xff] }
  0x8f   : > { %v2157_v62 = vmul.f32 %v595_v45, %v587_v40  ;;  %v604_v43 = vmin.f32 %v2864_v2, %v2863_v12  ;;  %v605_v18 = vmin.f32 %v2866_v38, %v2865_v6  ;;  %v606_v20 = vmin.f32 %v2868_v0, %v2867_v60  ;;  %v2872_v13 = vld [vmem:[#allocation43_spill] sm:$0xff]  ;;  %v2874_v54 = vld [vmem:[#allocation22_spill] sm:$0xff]  ;;  %v2875_v40 = vld [vmem:[#allocation48_spill] sm:$0xff] }
  0x90   : > { %v900_v7 = vadd.f32 %v899_v25, %v825_v47  ;;  %2861 = vst [vmem:[#allocation78_spill] sm:$0xff] %v2155_v30  ;;  %v612_v44 = vmax.f32 %v2870_v61, %v2869_v41  ;;  %v613_v1 = vmax.f32 %v2872_v13, %v2871_v34  ;;  %v2873_v31 = vld [vmem:[#allocation47_spill] sm:$0xff]  ;;  %v608_v53 = vmin.f32 %v2876_v9, %v2875_v40  ;;  %v2879_v46 = vld [vmem:[#allocation53_spill] sm:$0xff]  ;;  %v2881_v11 = vld [vmem:[#allocation54_spill] sm:$0xff] }
  0x91   : > { %2862 = vst [vmem:[#allocation79_spill] sm:$0xff] %v2157_v62  ;;  %v607_v45 = vmin.f32 %v2874_v54, %v2873_v31  ;;  %v2878_v26 = vld [vmem:[#allocation23_spill] sm:$0xff]  ;;  %v2882_v47 = vld [vmem:[#allocation28_spill] sm:$0xff]  ;;  %v2885_v60 = vld [vmem:[#allocation65_spill] sm:$0xff] }
  0x92   : > { %v901_v28 = vadd.f32 %v900_v7, %v826_v10  ;;  %v609_v56 = vmin.f32 %v2878_v26, %v2877_v59  ;;  %v2880_v10 = vld [vmem:[#allocation25_spill] sm:$0xff]  ;;  %v611_v25 = vmin.f32 %v2882_v47, %v2881_v11  ;;  %v2883_v7 = vld [vmem:[#allocation64_spill] sm:$0xff]  ;;  %v2887_v54 = vld [vmem:[#allocation66_spill] sm:$0xff]  ;;  %v620_v47 = vsub.f32 %v604_v43, %v612_v44 }
  0x93   : > { %v610_v39 = vmin.f32 %v2880_v10, %v2879_v46  ;;  %v614_v0 = vmax.f32 %v2884_v52, %v2883_v7  ;;  %v2886_v13 = vld [vmem:[#allocation45_spill] sm:$0xff]  ;;  %v2889_v9 = vld [vmem:[#allocation67_spill] sm:$0xff]  ;;  %v2890_v40 = vld [vmem:[#allocation50_spill] sm:$0xff]  ;;  %v621_v11 = vsub.f32 %v605_v18, %v613_v1  ;;  %v636_v46 = vmin.f32 %v1856_v15, %v1974_v37 }
  0x94   : > { %v902_v17 = vadd.f32 %v901_v28, %v827_v22  ;;  %v615_v34 = vmax.f32 %v2886_v13, %v2885_v60  ;;  %v2888_v31 = vld [vmem:[#allocation49_spill] sm:$0xff]  ;;  %v617_v6 = vmax.f32 %v2890_v40, %v2889_v9  ;;  %v2891_v26 = vld [vmem:[#allocation68_spill] sm:$0xff]  ;;  %v2892_v59 = vld [vmem:[#allocation51_spill] sm:$0xff]  ;;  %v637_v13 = vmin.f32 %v1859_v55, %v1977_v33 }
  0x95   : > { %v616_v38 = vmax.f32 %v2888_v31, %v2887_v54  ;;  %v618_v61 = vmax.f32 %v2892_v59, %v2891_v26  ;;  %v2893_v10 = vld [vmem:[#allocation69_spill] sm:$0xff]  ;;  %v2894_v22 = vld [vmem:[#allocation55_spill] sm:$0xff]  ;;  %v638_v31 = vmin.f32 %v1862_v35, %v1980_v27  ;;  %v2895_v40 = vld [vmem:[#allocation30_spill] sm:$0xff]  ;;  %v644_v44 = vmax.f32 %v1799_v36, %v2832_v48 }
  0x96   : > { %v619_v28 = vmax.f32 %v2894_v22, %v2893_v10  ;;  %903 = vadd.xlane.f32.xlu0 %v902_v17  ;;  %v639_v9 = vmin.f32 %v2895_v40, %v1985_v51  ;;  %v2896_v54 = vld [vmem:[#allocation60_spill] sm:$0xff]  ;;  %v2897_v59 = vld [vmem:[#allocation38_spill] sm:$0xff]  ;;  %v2898_v60 = vld [vmem:[#allocation61_spill] sm:$0xff]  ;;  %v645_v1 = vmax.f32 %v2846_v5, %v2833_v49  ;;  %v623_v41 = vsub.f32 %v607_v45, %v615_v34 }
  0x97   : > { %v640_v26 = vmin.f32 %v2897_v59, %v2896_v54  ;;  %v2899_v22 = vld [vmem:[#allocation37_spill] sm:$0xff]  ;;  %v2900_v43 = vld [vmem:[#allocation94_spill] sm:$0xff]  ;;  %v2903_v51 = vld [vmem:[#allocation87_spill] sm:$0xff]  ;;  %v652_v7 = vsub.f32 %v636_v46, %v644_v44  ;;  %v624_v2 = vsub.f32 %v608_v53, %v616_v38  ;;  %v625_v12 = vsub.f32 %v609_v56, %v617_v6 }
  0x98   : > { %v641_v17 = vmin.f32 %v2899_v22, %v2898_v60  ;;  %v642_v18 = vmin.f32 %v2900_v43, %v1994_v3  ;;  %v2901_v10 = vld [vmem:[#allocation86_spill] sm:$0xff]  ;;  %v2902_v35 = vld [vmem:[#allocation73_spill] sm:$0xff]  ;;  %v2905_v54 = vld [vmem:[#allocation88_spill] sm:$0xff]  ;;  %v629_v19 = vmax.f32 %v621_v11, 0.0 }
  0x99   : > { %v646_v27 = vmax.f32 %v2901_v10, %v2847_v42  ;;  %v647_v40 = vmax.f32 %v2903_v51, %v2902_v35  ;;  %v2904_v33 = vld [vmem:[#allocation74_spill] sm:$0xff]  ;;  %v2906_v55 = vld [vmem:[#allocation75_spill] sm:$0xff]  ;;  %v2907_v60 = vld [vmem:[#allocation89_spill] sm:$0xff]  ;;  %v653_v42 = vsub.f32 %v637_v13, %v645_v1  ;;  %v622_v10 = vsub.f32 %v606_v20, %v614_v0 }
  0x9a   : > { %v648_v59 = vmax.f32 %v2905_v54, %v2904_v33  ;;  %v649_v22 = vmax.f32 %v2907_v60, %v2906_v55  ;;  %v2908_v37 = vld [vmem:[#allocation32_spill] sm:$0xff]  ;;  %v2909_v3 = vld [vmem:[#allocation90_spill] sm:$0xff]  ;;  %v2910_v15 = vld [vmem:[#allocation97_spill] sm:$0xff]  ;;  %v626_v60 = vsub.f32 %v610_v39, %v618_v61  ;;  %v628_v55 = vmax.f32 %v620_v47, 0.0 }
  0x9b   : > { %v650_v43 = vmax.f32 %v2909_v3, %v2908_v37  ;;  %v2911_v48 = vld [vmem:[#allocation95_spill] sm:$0xff]  ;;  %v2912_v52 = vld [vmem:[#allocation33_spill] sm:$0xff]  ;;  %v654_v35 = vsub.f32 %v638_v31, %v646_v27  ;;  %v655_v51 = vsub.f32 %v639_v9, %v647_v40  ;;  %v660_v3 = vmax.f32 %v652_v7, 0.0  ;;  %v2926_v56 = vld [vmem:[#allocation62_spill] sm:$0xff] }
  0x9c   : > { %v643_v36 = vmin.f32 %v2911_v48, %v2910_v15  ;;  %v2913_v49 = vld [vmem:[#allocation91_spill] sm:$0xff]  ;;  %v656_v62 = vsub.f32 %v640_v26, %v648_v59  ;;  %v657_v57 = vsub.f32 %v641_v17, %v649_v22  ;;  %v627_v37 = vsub.f32 %v611_v25, %v619_v28  ;;  %v2925_v59 = vld [vmem:[#allocation92_spill] sm:$0xff]  ;;  %v2928_v11 = vld [vmem:[#allocation42_spill] sm:$0xff] }
  0x9d   : > { %v651_v5 = vmax.f32 %v2913_v49, %v2912_v52  ;;  %v658_v30 = vsub.f32 %v642_v18, %v650_v43  ;;  %v661_v48 = vmax.f32 %v653_v42, 0.0  ;;  %v630_v54 = vmax.f32 %v622_v10, 0.0  ;;  %v2924_v53 = vld [vmem:[#allocation39_spill] sm:$0xff]  ;;  %v2927_v10 = vld [vmem:[#allocation41_spill] sm:$0xff]  ;;  %v2932_v43 = vld [vmem:[#allocation46_spill] sm:$0xff] }
  0x9e   : > { %v631_v49 = vmax.f32 %v623_v41, 0.0  ;;  %v662_v46 = vmax.f32 %v654_v35, 0.0  ;;  %v663_v13 = vmax.f32 %v655_v51, 0.0  ;;  %v632_v0 = vmax.f32 %v624_v2, 0.0  ;;  %v2929_v47 = vld [vmem:[#allocation93_spill] sm:$0xff]  ;;  %v2930_v7 = vld [vmem:[#allocation63_spill] sm:$0xff] }
  0x9f   : > { %v659_v15 = vsub.f32 %v643_v36, %v651_v5  ;;  %v633_v20 = vmax.f32 %v625_v12, 0.0  ;;  %v664_v27 = vmax.f32 %v656_v62, 0.0  ;;  %v665_v34 = vmax.f32 %v657_v57, 0.0  ;;  %v2923_v62 = vld [vmem:[#allocation91_spill] sm:$0xff]  ;;  %v2933_v18 = vld [vmem:[#allocation20_spill] sm:$0xff] }
  0xa0   : > { %v634_v38 = vmax.f32 %v626_v60, 0.0  ;;  %v666_v6 = vmax.f32 %v658_v30, 0.0  ;;  %v2223_v31 = vmul.f32 %v660_v3, %v628_v55  ;;  %v676_v61 = vadd.f32 %v2143_v16, %v2127_v50  ;;  %v2915_v50 = vld [vmem:[#allocation76_spill] sm:$0xff]  ;;  %v2916_v3 = vld [vmem:[#allocation78_spill] sm:$0xff]  ;;  %v2931_v22 = vld [vmem:[#allocation43_spill] sm:$0xff] }
  0xa1   : > { %v635_v45 = vmax.f32 %v627_v37, 0.0  ;;  %v667_v40 = vmax.f32 %v659_v15, 0.0  ;;  %v2227_v9 = vmul.f32 %v661_v48, %v629_v19  ;;  %v677_v5 = vadd.f32 %v2145_v4, %v2129_v24  ;;  %v2914_v24 = vld [vmem:[#allocation88_spill] sm:$0xff]  ;;  %v2918_v19 = vld [vmem:[#allocation89_spill] sm:$0xff] }
  0xa2   : > { %v2231_v36 = vmul.f32 %v662_v46, %v630_v54  ;;  %v2233_v35 = vmul.f32 %v663_v13, %v631_v49  ;;  %v678_v42 = vadd.f32 %v2147_v63, %v2131_v23  ;;  %v679_v55 = vadd.f32 %v2149_v8, %v2133_v58  ;;  %v2917_v23 = vld [vmem:[#allocation75_spill] sm:$0xff]  ;;  %v2934_v1 = vld [vmem:[#allocation64_spill] sm:$0xff] }
  0xa3   : > { %v2239_v51 = vmul.f32 %v664_v27, %v632_v0  ;;  %v2241_v16 = vmul.f32 %v665_v34, %v633_v20  ;;  %v680_v48 = vadd.f32 %v2151_v14, %v2135_v32  ;;  %v681_v15 = vadd.f32 %v2153_v29, %v2137_v21  ;;  %v2919_v32 = vld [vmem:[#allocation77_spill] sm:$0xff]  ;;  %v2920_v8 = vld [vmem:[#allocation79_spill] sm:$0xff]  ;;  %v2922_v29 = vld [vmem:[#allocation90_spill] sm:$0xff] }
  0xa4   : > { %v752_v49 = vmin.f32 %v2914_v24, %v2904_v33  ;;  %v2249_v37 = vmul.f32 %v666_v6, %v634_v38  ;;  %v682_v57 = vadd.f32 %v2916_v3, %v2915_v50  ;;  %v2254_v58 = vsub.f32 %v676_v61, %v2223_v31  ;;  %v2921_v33 = vld [vmem:[#allocation32_spill] sm:$0xff]  ;;  %v2936_v0 = vld [vmem:[#allocation47_spill] sm:$0xff]  ;;  %v2937_v20 = vld [vmem:[#allocation22_spill] sm:$0xff] }
  0xa5   : > { %v753_v4 = vmin.f32 %v2918_v19, %v2917_v23  ;;  %v2258_v63 = vmul.f32 %v667_v40, %v635_v45  ;;  %v683_v14 = vadd.f32 %v2920_v8, %v2919_v32  ;;  %v2263_v21 = vsub.f32 %v677_v5, %v2227_v9  ;;  %v2935_v46 = vld [vmem:[#allocation44_spill] sm:$0xff]  ;;  %v2940_v61 = vld [vmem:[#allocation65_spill] sm:$0xff]  ;;  %v2946_v50 = vld [vmem:[#allocation66_spill] sm:$0xff] }
  0xa6   : > { %v754_v30 = vmin.f32 %v2922_v29, %v2921_v33  ;;  %v755_v12 = vmin.f32 %v2923_v62, %v2912_v52  ;;  %v2270_v2 = vsub.f32 %v678_v42, %v2231_v36  ;;  %v2273_v60 = vsub.f32 %v679_v55, %v2233_v35  ;;  %v2938_v34 = vld [vmem:[#allocation48_spill] sm:$0xff]  ;;  %v2941_v45 = vld [vmem:[#allocation45_spill] sm:$0xff]  ;;  %v2943_v42 = vld [vmem:[#allocation23_spill] sm:$0xff] }
  0xa7   : > { %v2276_v41 = vsub.f32 %v680_v48, %v2239_v51  ;;  %v2279_v54 = vsub.f32 %v681_v15, %v2241_v16  ;;  %v708_v26 = vmax.f32 %v2925_v59, %v2924_v53  ;;  %v716_v39 = vmin.f32 %v2927_v10, %v2926_v56  ;;  %v2939_v38 = vld [vmem:[#allocation24_spill] sm:$0xff]  ;;  %v2944_v48 = vld [vmem:[#allocation53_spill] sm:$0xff]  ;;  %v2948_v19 = vld [vmem:[#allocation54_spill] sm:$0xff] }
  0xa8   : > { %v2286_v52 = vsub.f32 %v682_v57, %v2249_v37  ;;  %1189 = vrcp.f32 %v2254_v58  ;;  %v709_v25 = vmax.f32 %v2929_v47, %v2928_v11  ;;  %v717_v28 = vmin.f32 %v2931_v22, %v2930_v7  ;;  %v2942_v5 = vld [vmem:[#allocation52_spill] sm:$0xff]  ;;  %v2945_v15 = vld [vmem:[#allocation25_spill] sm:$0xff]  ;;  %v2951_v33 = vld [vmem:[#allocation50_spill] sm:$0xff] }
  0xa9   : > { %v2294_v17 = vsub.f32 %v683_v14, %v2258_v63  ;;  %1191 = vrcp.f32 %v2263_v21  ;;  %v710_v44 = vmax.f32 %v2933_v18, %v2932_v43  ;;  %v718_v13 = vmin.f32 %v2935_v46, %v2934_v1  ;;  %v2947_v3 = vld [vmem:[#allocation49_spill] sm:$0xff]  ;;  %v2949_v32 = vld [vmem:[#allocation28_spill] sm:$0xff]  ;;  %v2950_v14 = vld [vmem:[#allocation67_spill] sm:$0xff] }
  0xaa   : > { %1193 = vrcp.f32 %v2270_v2  ;;  %v711_v27 = vmax.f32 %v2937_v20, %v2936_v0  ;;  %v712_v6 = vmax.f32 %v2939_v38, %v2938_v34  ;;  %v719_v40 = vmin.f32 %v2941_v45, %v2940_v61  ;;  %v2952_v62 = vld [vmem:[#allocation68_spill] sm:$0xff]  ;;  %v2953_v53 = vld [vmem:[#allocation51_spill] sm:$0xff]  ;;  %v2955_v47 = vld [vmem:[#allocation70_spill] sm:$0xff] }
  0xab   : > { %v713_v55 = vmax.f32 %v2943_v42, %v2942_v5  ;;  %v714_v24 = vmax.f32 %v2945_v15, %v2944_v48  ;;  %v720_v57 = vmin.f32 %v2947_v3, %v2946_v50  ;;  %v724_v23 = vsub.f32 %v708_v26, %v716_v39  ;;  %v2954_v11 = vld [vmem:[#allocation84_spill] sm:$0xff]  ;;  %v2957_v22 = vld [vmem:[#allocation26_spill] sm:$0xff]  ;;  %v2960_v46 = vld [vmem:[#allocation85_spill] sm:$0xff] }
  0xac   : > { %v715_v8 = vmax.f32 %v2949_v32, %v2948_v19  ;;  %v721_v29 = vmin.f32 %v2951_v33, %v2950_v14  ;;  %v722_v59 = vmin.f32 %v2953_v53, %v2952_v62  ;;  %v725_v56 = vsub.f32 %v709_v25, %v717_v28  ;;  %v2958_v43 = vld [vmem:[#allocation56_spill] sm:$0xff]  ;;  %v2961_v26 = vld [vmem:[#allocation71_spill] sm:$0xff]  ;;  %v2963_v0 = vld [vmem:[#allocation29_spill] sm:$0xff] }
  0xad   : > { %v726_v10 = vsub.f32 %v710_v44, %v718_v13  ;;  %v2956_v7 = vmin.f32 %v2954_v11, %v2955_v47  ;;  %v2959_v18 = vmax.f32 %v2957_v22, %v2958_v43  ;;  %v2962_v39 = vmin.f32 %v2960_v46, %v2961_v26  ;;  %v2964_v20 = vld [vmem:[#allocation57_spill] sm:$0xff]  ;;  %v2966_v61 = vld [vmem:[#allocation86_spill] sm:$0xff]  ;;  %v2967_v45 = vld [vmem:[#allocation72_spill] sm:$0xff] }
  0xae   : > { %v2965_v34 = vmax.f32 %v2963_v0, %v2964_v20  ;;  %v2968_v5 = vmin.f32 %v2966_v61, %v2967_v45  ;;  %v2969_v42 = vld [vmem:[#allocation31_spill] sm:$0xff]  ;;  %v2970_v25 = vld [vmem:[#allocation58_spill] sm:$0xff]  ;;  %1195 = vrcp.f32 %v2273_v60  ;;  %v2972_v13 = vld [vmem:[#allocation69_spill] sm:$0xff]  ;;  %v727_v50 = vsub.f32 %v711_v27, %v719_v40 }
  0xaf   : > { %v756_v1 = vsub.f32 %v2959_v18, %v2956_v7  ;;  %v2971_v28 = vmax.f32 %v2969_v42, %v2970_v25  ;;  %v2973_v48 = vld [vmem:[#allocation55_spill] sm:$0xff]  ;;  %v2975_v19 = vld [vmem:[#allocation73_spill] sm:$0xff]  ;;  %v2977_v14 = vld [vmem:[#allocation30_spill] sm:$0xff]  ;;  %v728_v11 = vsub.f32 %v712_v6, %v720_v57  ;;  %v732_v47 = vmax.f32 %v724_v23, 0.0 }
  0xb0   : > { %v757_v38 = vsub.f32 %v2965_v34, %v2962_v39  ;;  %v723_v15 = vmin.f32 %v2973_v48, %v2972_v13  ;;  %v2974_v3 = vld [vmem:[#allocation87_spill] sm:$0xff]  ;;  %v2980_v7 = vld [vmem:[#allocation38_spill] sm:$0xff]  ;;  %v2981_v22 = vld [vmem:[#allocation60_spill] sm:$0xff]  ;;  %v729_v26 = vsub.f32 %v713_v55, %v721_v29  ;;  %v733_v39 = vmax.f32 %v725_v56, 0.0 }
  0xb1   : > { %v758_v44 = vsub.f32 %v2971_v28, %v2968_v5  ;;  %v2976_v32 = vmin.f32 %v2974_v3, %v2975_v19  ;;  %v2978_v33 = vld [vmem:[#allocation59_spill] sm:$0xff]  ;;  %v2982_v43 = vmax.f32 %v2980_v7, %v2981_v22  ;;  %v764_v46 = vmax.f32 %v756_v1, 0.0  ;;  %v2983_v0 = vld [vmem:[#allocation37_spill] sm:$0xff]  ;;  %v2986_v5 = vld [vmem:[#allocation94_spill] sm:$0xff] }
  0xb2   : > { %v2979_v62 = vmax.f32 %v2977_v14, %v2978_v33  ;;  %v2984_v20 = vld [vmem:[#allocation61_spill] sm:$0xff]  ;;  %v765_v40 = vmax.f32 %v757_v38, 0.0  ;;  %v730_v61 = vsub.f32 %v714_v24, %v722_v59  ;;  %v734_v45 = vmax.f32 %v726_v10, 0.0  ;;  %v2987_v42 = vld [vmem:[#allocation96_spill] sm:$0xff]  ;;  %v1190_v57 = vpop.eup %1189  ;;  %v2989_v48 = vld [vmem:[#allocation95_spill] sm:$0xff] }
  0xb3   : > { %v760_v18 = vsub.f32 %v2982_v43, %v752_v49  ;;  %v2985_v34 = vmax.f32 %v2983_v0, %v2984_v20  ;;  %v2988_v25 = vmax.f32 %v2986_v5, %v2987_v42  ;;  %v766_v6 = vmax.f32 %v758_v44, 0.0  ;;  %v2990_v49 = vld [vmem:[#allocation97_spill] sm:$0xff]  ;;  %v1192_v56 = vpop.eup %1191 }
  0xb4   : > { %v759_v53 = vsub.f32 %v2979_v62, %v2976_v32  ;;  %v731_v23 = vsub.f32 %v715_v8, %v723_v15  ;;  %v735_v13 = vmax.f32 %v727_v50, 0.0  ;;  %v2991_v1 = vmax.f32 %v2989_v48, %v2990_v49  ;;  %v1194_v59 = vpop.eup %1193 }
  0xb5   : > { %v761_v27 = vsub.f32 %v2985_v34, %v753_v4  ;;  %v762_v28 = vsub.f32 %v2988_v25, %v754_v30  ;;  %1197 = vrcp.f32 %v2276_v41  ;;  %v736_v4 = vmax.f32 %v728_v11, 0.0 }
  0xb6   : > { %v763_v55 = vsub.f32 %v2991_v1, %v755_v12  ;;  %v767_v29 = vmax.f32 %v759_v53, 0.0  ;;  %v768_v38 = vmax.f32 %v760_v18, 0.0  ;;  %v772_v24 = vmul.f32 %v764_v46, %v732_v47 }
  0xb7   : > { %1199 = vrcp.f32 %v2279_v54  ;;  %v737_v10 = vmax.f32 %v729_v26, 0.0  ;;  %v769_v30 = vmax.f32 %v761_v27, 0.0  ;;  %v773_v44 = vmul.f32 %v765_v40, %v733_v39 }
  0xb8   : > { %1201 = vrcp.f32 %v2286_v52  ;;  %v738_v8 = vmax.f32 %v730_v61, 0.0  ;;  %v770_v15 = vmax.f32 %v762_v28, 0.0  ;;  %v774_v50 = vmul.f32 %v766_v6, %v734_v45  ;;  %v1196_v14 = vpop.eup %1195 }
  0xb9   : > { %1203 = vrcp.f32 %v2294_v17  ;;  %v739_v12 = vmax.f32 %v731_v23, 0.0  ;;  %v771_v3 = vmax.f32 %v763_v55, 0.0  ;;  %v775_v19 = vmul.f32 %v767_v29, %v735_v13 }
  0xba   : > { %v776_v32 = vmul.f32 %v768_v38, %v736_v4  ;;  %1205 = vrcp.f32 %v772_v24  ;;  %v777_v33 = vmul.f32 %v769_v30, %v737_v10  ;;  %v778_v62 = vmul.f32 %v770_v15, %v738_v8 }
  0xbb   : > { %1207 = vrcp.f32 %v773_v44  ;;  %v779_v53 = vmul.f32 %v771_v3, %v739_v12  ;;  %v780_v7 = vsub.f32 %v772_v24, %v2254_v58  ;;  %v781_v43 = vsub.f32 %v773_v44, %v2263_v21 }
  0xbc   : > { %1209 = vrcp.f32 %v774_v50  ;;  %v700_v46 = vmul.f32 %v1190_v57, %v2223_v31  ;;  %v782_v26 = vsub.f32 %v774_v50, %v2270_v2  ;;  %v701_v0 = vmul.f32 %v1192_v56, %v2227_v9 }
  0xbd   : > { %1211 = vrcp.f32 %v775_v19  ;;  %v783_v20 = vsub.f32 %v775_v19, %v2273_v60  ;;  %v702_v27 = vmul.f32 %v1194_v59, %v2231_v36  ;;  %v784_v40 = vsub.f32 %v776_v32, %v2276_v41 }
  0xbe   : > { %1213 = vrcp.f32 %v776_v32  ;;  %v703_v45 = vmul.f32 %v1196_v14, %v2233_v35  ;;  %v785_v21 = vsub.f32 %v777_v33, %v2279_v54  ;;  %v786_v42 = vsub.f32 %v778_v62, %v2286_v52 }
  0xbf   : > { %1215 = vrcp.f32 %v777_v33  ;;  %v1198_v11 = vpop.eup %1197  ;;  %v787_v36 = vsub.f32 %v779_v53, %v2294_v17 }
  0xc0   : > { %1217 = vrcp.f32 %v778_v62  ;;  %v704_v2 = vmul.f32 %v1198_v11, %v2239_v51 }
  0xc1   : > { %v1200_v47 = vpop.eup %1199  ;;  %1219 = vrcp.f32 %v779_v53 }
  0xc2   : > { %v1202_v22 = vpop.eup %1201  ;;  %v705_v28 = vmul.f32 %v1200_v47, %v2241_v16 }
  0xc3   : > { %v1204_v18 = vpop.eup %1203  ;;  %v706_v35 = vmul.f32 %v1202_v22, %v2249_v37 }
  0xc4   : > { %v1206_v39 = vpop.eup %1205  ;;  %v707_v51 = vmul.f32 %v1204_v18, %v2258_v63 }
  0xc5   : > { %v1208_v34 = vpop.eup %1207  ;;  %v796_v58 = vmul.f32 %v1206_v39, %v780_v7 }
  0xc6   : > { %v1210_v61 = vpop.eup %1209  ;;  %v797_v5 = vmul.f32 %v1208_v34, %v781_v43 }
  0xc7   : > { %v1212_v31 = vpop.eup %1211  ;;  %v798_v9 = vmul.f32 %v1210_v61, %v782_v26  ;;  %v804_v25 = vsub.f32 %v700_v46, %v796_v58 }
  0xc8   : > { %v1214_v60 = vpop.eup %1213  ;;  %v799_v41 = vmul.f32 %v1212_v31, %v783_v20  ;;  %v805_v6 = vsub.f32 %v701_v0, %v797_v5 }
  0xc9   : > { %v1216_v57 = vpop.eup %1215  ;;  %v800_v23 = vmul.f32 %v1214_v60, %v784_v40  ;;  %v806_v54 = vsub.f32 %v702_v27, %v798_v9  ;;  %v852_v13 = vsub.f32 1.0, %v804_v25 }
  0xca   : > { %v1218_v48 = vpop.eup %1217  ;;  %v801_v49 = vmul.f32 %v1216_v57, %v785_v21  ;;  %v807_v52 = vsub.f32 %v703_v45, %v799_v41  ;;  %v853_v1 = vsub.f32 1.0, %v805_v6  ;;  %v913_v41 = vstv %s887_s30  ;;  %v3001_v6 = vld [vmem:[#allocation15_spill] sm:$0xff]  ;;  %v3002_v57 = vld [vmem:[#allocation16_spill] sm:$0xff] }
  0xcb   : > { %v1220_v55 = vpop.eup %1219  ;;  %v802_v29 = vmul.f32 %v1218_v48, %v786_v42  ;;  %v808_v56 = vsub.f32 %v704_v2, %v800_v23  ;;  %v854_v16 = vsub.f32 1.0, %v806_v54  ;;  %v860_v38 = vsel %vm364_vm0, %v852_v13, 0.0 }
  0xcc   : > { %v803_v24 = vmul.f32 %v1220_v55, %v787_v36  ;;  %v809_v59 = vsub.f32 %v705_v28, %v801_v49  ;;  %v855_v37 = vsub.f32 1.0, %v807_v52  ;;  %v861_v30 = vsel %vm365_vm1, %v853_v1, 0.0 }
  0xcd   : > { %v810_v44 = vsub.f32 %v706_v35, %v802_v29  ;;  %v856_v63 = vsub.f32 1.0, %v808_v56  ;;  %v862_v15 = vsel %vm366_vm2, %v854_v16, 0.0  ;;  %v923_v50 = vadd.f32 %v861_v30, %v860_v38 }
  0xce   : > { %v811_v12 = vsub.f32 %v707_v51, %v803_v24  ;;  %v857_v3 = vsub.f32 1.0, %v809_v59  ;;  %v863_v32 = vsel %vm367_vm3, %v855_v37, 0.0  ;;  %vm941_vm8 = vcmp.eq.s32.totalorder %v3001_v6, 0 }
  0xcf   : > { %v924_v14 = vadd.f32 %v923_v50, %v862_v15  ;;  %v858_v33 = vsub.f32 1.0, %v810_v44  ;;  %v864_v53 = vsel %vm368_vm4, %v856_v63, 0.0  ;;  %vm942_vm9 = vcmp.eq.s32.totalorder %v3002_v57, 0 }
  0xd0   : > { %v859_v47 = vsub.f32 1.0, %v811_v12  ;;  %v865_v22 = vsel %vm369_vm5, %v857_v3, 0.0  ;;  %vm945_vm10 = vcmp.eq.s32.totalorder %v3002_v57, 1  ;;  %vm943_vm11 = vmand %vm941_vm8, %vm942_vm9 }
  0xd1   : > { %v925_v11 = vadd.f32 %v924_v14, %v863_v32  ;;  %v866_v46 = vsel %vm370_vm6, %v858_v33, 0.0  ;;  %vm946_vm12 = vmand %vm941_vm8, %vm945_vm10 }
  0xd2   : > { %v867_v0 = vsel %vm371_vm7, %v859_v47, 0.0 }
  0xd3   : > { %v926_v43 = vadd.f32 %v925_v11, %v864_v53 }
  0xd5   : > { %v927_v26 = vadd.f32 %v926_v43, %v865_v22 }
  0xd7   : > { %v928_v20 = vadd.f32 %v927_v26, %v866_v46 }
  0xd9   : > { %v929_v34 = vadd.f32 %v928_v20, %v867_v0 }
  0xdb   : > { %930 = vadd.xlane.f32.xlu0 %v929_v34 }
 0x123   : > { %v904_v27 = vpop.xlane.xlu0 %903 }
 0x124   : > { %v905_v40 = vrot.slane %v904_v27, 4 }
 0x126   : > { %v906_v58 = vadd.f32 %v905_v40, %v904_v27 }
 0x128   : > { %v907_v61 = vrot.slane %v906_v58, 2 }
 0x12a   : > { %v908_v45 = vadd.f32 %v907_v61, %v906_v58 }
 0x12c   : > { %v909_v21 = vrot.slane %v908_v45, 1 }
 0x12e   : > { %v910_v5 = vadd.f32 %v909_v21, %v908_v45 }
 0x130   : > { %1116 = vpush %v910_v5 }
 0x161   : > { %s1117_s9 = spop %1116 }
 0x162   : > { %v912_v36 = vstv %s1117_s9 }
 0x163   : > { %v914_v35 = vmul.f32 %v913_v41, %v912_v36 }
 0x165   : > { %v944_v13 = vsel %vm943_vm11, %v914_v35, 0.0 }
 0x168   : > { %v931_v31 = vpop.xlane.xlu0 %930 }
 0x169   : > { %v932_v2 = vrot.slane %v931_v31, 4 }
 0x16b   : > { %v933_v42 = vadd.f32 %v932_v2, %v931_v31 }
 0x16d   : > { %v934_v9 = vrot.slane %v933_v42, 2 }
 0x16f   : > { %v935_v25 = vadd.f32 %v934_v9, %v933_v42 }
 0x171   : > { %v936_v60 = vrot.slane %v935_v25, 1 }
 0x173   : > { %v937_v28 = vadd.f32 %v936_v60, %v935_v25 }
 0x175   : > { %1118 = vpush %v937_v28 }
 0x1a6   : > { %s1119_s12 = spop %1118 }
 0x1a7   : > { %v939_v23 = vstv %s1119_s12 }
 0x1a8   : > { %v940_v54 = vmul.f32 %v939_v23, %v913_v41 }
 0x1aa   : > { %v947_v48 = vsel %vm946_vm12, %v940_v54, %v944_v13 }
 0x1ab   : > { %948 = vst [vmem:[%s230_s13] sm:$0xff] %v947_v48 }
 0x1ac   : > { %1234 = shalt.err (!%p1231_p8)
}
 0x1ad   : > { %s1235_s5 = scalar_lea.hbm %s2411_s1, 128  ;;  %s1239_s24 = scalar_lea.hbm %s2463_s3, 256 }
 0x1ae   : > { %p1236_p10 = scmp.ne.s32.totalorder %s2411_s1, %s1235_s5  ;;  %p1240_p1 = scmp.lt.u32.totalorder %s2411_s1, %s2463_s3 }
 0x1af   : > { %p1241_p2 = scmp.lt.u32.totalorder %s1239_s24, %s1235_s5  ;;  %p1243_p4 = scmp.lt.u32.totalorder %s1235_s5, %s2411_s1 }
 0x1b0   : > { %p1237_p13 = pnand %p1236_p10, %p1388_p9 }
 0x1b1   : > { %p1242_p3 = por %p1241_p2, %p1240_p1 }
 0x1b2   : > { %p1238_p0 = pneg %p1237_p13 }
 0x1b3   : > { %p1244_p5 = por %p1243_p4, %p1242_p3 }
 0x1b5   : > { %p1245_p6 = pnand %p1244_p5, %p1238_p0 }
 0x1b7   : > { %1248 = shalt.err (!%p1245_p6)
}
 0x1b8   : > { %1129 = dma.vmem_to_hbm [thread:$0]  (%p1388_p9), %s2413_s14, 128, %s2411_s1, %s950_s19  }
 0x1b9 PF: > { %s975_s9 = sand.u32 1, %s1283_s16   ;;  %p1132_p7 = pnand %p1045_p12, %p1395_p11 }
 0x1ba   : > { %s976_s10 = scalar_lea.sflag [#allocation8], %s975_s9 }
 0x1bb   : > { %1278 = dma.done.wait (!%p1132_p7), %s976_s10, 128  }
 0x1bc   : > { %1280 = vsyncadd (!%p1132_p7), %s976_s10, 4294967168  ;;  %s21_s21 = sadd.s32 1, %s1303_s21   ;;  %s3003_s16 = smov %s1287_s17 }
 0x1bd   : > { %p18_p8 = scmp.ge.s32.totalorder %s21_s21, 4   ;;  %s3004_s17 = smov %s1291_s18 }
 0x1be   : > { %s3005_s18 = smov %s1393_s28  ;;  %s3006_s19 = smov %s1299_s20 }
 0x1bf   : > { %s3007_s20 = smov %s3009_s22  ;;  %20 = sbr.rel (!%p18_p8) target bundleno = 9 (0x9), region = 97 }
 0x1c6   :  { %981 = vsyncpa [#allocation7], 1 }
 0x1c7   :  { %983 = vsyncpa [#allocation7 + $0x1], 1 }
 0x1c8   :  { %984 = vsyncpa [#allocation8], 1 }
 0x1c9   :  { %986 = vsyncpa [#allocation8 + $0x1], 1 }

</bundles_post_ra>
